<compile_context>
chip_gen: v7x
topology: tpu7x:2x2x1
jax: 0.10.0
libtpu: 0.0.40
codegen_flags: <defaults>
</compile_context>

<pallas_src>
import jax
import jax.numpy as jnp
from jax.experimental import pallas as pl
from jax.experimental.pallas import tpu as pltpu


_LANE = 128


def _round_up(n, m):
    return ((n + m - 1) // m) * m


def _sublane_granule(dtype):
    # rows per packed (sublane, lane) tile: 8 for 32-bit, 16 for 16-bit, 32 for 8-bit
    return 8 * (4 // jnp.dtype(dtype).itemsize)


def _select_batch_tiling(batch, tile_b, granule):
    """Pick (tile, padded_batch).

    * single-tile grids only need `granule`-aligned tiles;
    * multi-tile grids use 128-row multiples so the (1, tile) output block stays
      lane-dense (unmasked stores) and the MXU sees full-height tiles;
    * batches with >= two full 128-row tiles are split into >= 2 grid steps so
      the "parallel" batch axis can shard across both TensorCores on v7x.
    """
    tile_b = _round_up(max(int(tile_b), granule), granule)
    if batch <= tile_b:
        if batch >= 2 * _LANE:
            tile = _round_up(-(-batch // 2), _LANE)      # ceil(B/2), mult of 128
        else:
            tile = _round_up(batch, granule)             # one small tile
    else:
        num_tiles = -(-batch // tile_b)
        tile = _round_up(-(-batch // num_tiles), _LANE)  # balanced, mult of 128
    return tile, _round_up(batch, tile)


def mlp_kernel(x_ref,
               w1_ref, b1_ref,
               w2_ref, b2_ref,
               w3_ref, b3_ref,
               wo_ref, bo_ref,
               o_ref):
    """(tile_b, in_features) batch tile -> (1, tile_b) lane-dense output strip.

    Weights/biases are VMEM-resident for the whole grid (constant index_maps);
    only x / out tiles stream. All matmuls accumulate in f32 on the MXU; the
    bias-add + ReLU run on the f32 accumulator; the N=1 head is a VPU multiply
    + XLU lane reduction instead of a (H, 1) matmul.
    """
    # hidden layer 1
    h = jnp.dot(x_ref[...], w1_ref[...], preferred_element_type=jnp.float32)
    h = jnp.maximum(h + b1_ref[...], 0.0)
    # hidden layer 2
    h = jnp.dot(h.astype(w2_ref.dtype), w2_ref[...],
                preferred_element_type=jnp.float32)
    h = jnp.maximum(h + b2_ref[...], 0.0)
    # hidden layer 3
    h = jnp.dot(h.astype(w3_ref.dtype), w3_ref[...],
                preferred_element_type=jnp.float32)
    h = jnp.maximum(h + b3_ref[...], 0.0)
    # output head (hidden -> 1): multiply by the (1, H) weight row (VPU) and
    # lane-reduce (XLU); store as a lane-dense (1, tile_b) strip (unmasked vst)
    # instead of a (tile_b, 1) column of masked 1-lane stores.
    y = jnp.sum(h * wo_ref[...], axis=-1)          # (tile_b,)
    o_ref[...] = y[None, :] + bo_ref[...]          # (1, tile_b) + (1, 1)


def mlp_forward(x, params, *, tile_b=2048, compute_dtype=jnp.bfloat16):
    """params = (w1, b1, w2, b2, w3, b3, wo_row, bo).

    w1: (in, H), w2/w3: (H, H), b*: (1, H), wo_row: (1, H), bo: (1, 1).
    Returns (B, 1) float32, matching the PyTorch module's forward.
    """
    w1, b1, w2, b2, w3, b3, wo, bo = params
    B, F = x.shape

    granule = _sublane_granule(compute_dtype)
    tile, b_pad = _select_batch_tiling(B, tile_b, granule)
    if b_pad != B:
        x = jnp.pad(x, ((0, b_pad - B), (0, 0)))
    grid = (b_pad // tile,)

    # bf16 (default) operands for the matmuls; biases / head weight stay f32 since
    # bias-add, ReLU and the head reduction all run on the f32 accumulator.
    x = x.astype(compute_dtype)
    w1, w2, w3 = (w.astype(compute_dtype) for w in (w1, w2, w3))
    b1, b2, b3 = (b.astype(jnp.float32) for b in (b1, b2, b3))
    wo = wo.astype(jnp.float32)
    bo = bo.astype(jnp.float32)
    # TODO(synk): on v7x the two FLOP-dominant 256x256 layers (w2/w3) could drop
    # to fp8 (2x bf16 MXU rate) if accuracy allows; not applied here.

    x_spec = pl.BlockSpec((tile, F), lambda i: (i, 0))
    o_spec = pl.BlockSpec((1, tile), lambda i: (0, i))   # lane-dense output strip

    def resident(arr):
        # Whole array VMEM-resident across the entire grid (constant index_map ->
        # no per-step re-DMA). ~<1 MB total for the bf16 weights incl. the default
        # double buffers, so the extra buffer copy is harmless for the VMEM budget.
        return pl.BlockSpec(arr.shape, lambda i: (0, 0))

    in_specs = [x_spec,
                resident(w1), resident(b1),
                resident(w2), resident(b2),
                resident(w3), resident(b3),
                resident(wo), resident(bo)]

    out = pl.pallas_call(
        mlp_kernel,
        out_shape=jax.ShapeDtypeStruct((1, b_pad), jnp.float32),
        grid=grid,
        in_specs=in_specs,
        out_specs=o_spec,
        compiler_params=pltpu.CompilerParams(
            dimension_semantics=("parallel",),   # batch tiles shard across TCs (v7x)
            # x double-buffer + (tile, 256) f32 temps + resident weights is only
            # ~6-8 MB at tile=2048 bf16 — comfortably under v7x's 64 MiB VMEM.
            vmem_limit_bytes=48 * 1024 * 1024,
        ),
    )(x, w1, b1, w2, b2, w3, b3, wo, bo)

    return out[0, :B].reshape(B, 1)


def init_params(key, in_features, hidden_units=256, num_hidden_layers=3):
    """Deterministic, PyTorch-Linear-style uniform init (synthetic weights)."""
    dims = [in_features] + [hidden_units] * num_hidden_layers
    params = []
    keys = jax.random.split(key, num_hidden_layers + 1)
    for i in range(num_hidden_layers):
        fan_in, fan_out = dims[i], dims[i + 1]
        bound = 1.0 / float(fan_in) ** 0.5
        kw, kb = jax.random.split(keys[i])
        w = jax.random.uniform(kw, (fan_in, fan_out), jnp.float32, -bound, bound)
        b = jax.random.uniform(kb, (1, fan_out), jnp.float32, -bound, bound)
        params += [w, b]
    # output head (hidden_units -> 1), stored as a (1, hidden) row for the kernel
    fan_in = hidden_units
    bound = 1.0 / float(fan_in) ** 0.5
    kw, kb = jax.random.split(keys[-1])
    wo = jax.random.uniform(kw, (1, fan_in), jnp.float32, -bound, bound)
    bo = jax.random.uniform(kb, (1, 1), jnp.float32, -bound, bound)
    return tuple(params + [wo, bo])


def mlp_reference(x, params):
    w1, b1, w2, b2, w3, b3, wo, bo = params
    h = jnp.maximum(x @ w1 + b1, 0.0)
    h = jnp.maximum(h @ w2 + b2, 0.0)
    h = jnp.maximum(h @ w3 + b3, 0.0)
    return h @ wo.T + bo


if __name__ == "__main__":
    key = jax.random.PRNGKey(0)
    k_x, k_p = jax.random.split(key)

    batch = 384
    in_features = 32
    hidden_units = 256
    num_hidden_layers = 3

    x = jax.random.normal(k_x, (batch, in_features), jnp.float32)
    params = init_params(k_p, in_features, hidden_units, num_hidden_layers)
    ref = mlp_reference(x, params)

    # f32 path with a forced 3-step grid (128-row tiles) — exercises multi-step
    # streaming and the lane-dense (1, tile) output blocks.
    out_f32 = mlp_forward(x, params, tile_b=128, compute_dtype=jnp.float32)
    out_f32 = jax.block_until_ready(out_f32)
    assert out_f32.shape == (batch, 1), out_f32.shape
    assert jnp.allclose(out_f32, ref, atol=1e-4, rtol=1e-4), "f32 mismatch vs reference"

    # default (bf16, large-tile) path — batch auto-splits into 2 tiles of 256 rows
    out_bf16 = jax.block_until_ready(mlp_forward(x, params))
    assert out_bf16.shape == (batch, 1), out_bf16.shape
    assert jnp.allclose(out_bf16, ref, atol=7.5e-2, rtol=5e-2), "bf16 mismatch vs reference"

    # tiny odd batch — exercises batch padding (16-row packed bf16 tile) + slicing
    x_small = x[:13]
    out_small = jax.block_until_ready(mlp_forward(x_small, params))
    assert out_small.shape == (13, 1), out_small.shape
    assert jnp.allclose(out_small, mlp_reference(x_small, params),
                        atol=7.5e-2, rtol=5e-2), "small-batch mismatch vs reference"

    print("KERNEL_OK")
</pallas_src>

<mosaic_0001>
module attributes {stable_mosaic.version = 11 : i64} {
  func.func @mlp_kernel(%arg0: i32, %arg1: memref<128x32xf32, #tpu.memory_space<vmem>>, %arg2: memref<32x256xf32, #tpu.memory_space<vmem>>, %arg3: memref<1x256xf32, #tpu.memory_space<vmem>>, %arg4: memref<256x256xf32, #tpu.memory_space<vmem>>, %arg5: memref<1x256xf32, #tpu.memory_space<vmem>>, %arg6: memref<256x256xf32, #tpu.memory_space<vmem>>, %arg7: memref<1x256xf32, #tpu.memory_space<vmem>>, %arg8: memref<1x256xf32, #tpu.memory_space<vmem>>, %arg9: memref<1x1xf32, #tpu.memory_space<vmem>>, %arg10: memref<1x128xf32, #tpu.memory_space<vmem>>) attributes {dimension_semantics = [#tpu.dimension_semantics<parallel>], iteration_bounds = array<i64: 3>, scalar_prefetch = 0 : i64, scratch_operands = 0 : i64, tpu.core_type = #tpu.core_type<tc>, window_params = [{transform_indices = @transform_0, window_bounds = array<i64: 128, 32>}, {pipeline_mode = #tpu.pipeline_mode<synchronous>, transform_indices = @transform_1, window_bounds = array<i64: 32, 256>}, {pipeline_mode = #tpu.pipeline_mode<synchronous>, transform_indices = @transform_2, window_bounds = array<i64: 1, 256>}, {pipeline_mode = #tpu.pipeline_mode<synchronous>, transform_indices = @transform_3, window_bounds = array<i64: 256, 256>}, {pipeline_mode = #tpu.pipeline_mode<synchronous>, transform_indices = @transform_4, window_bounds = array<i64: 1, 256>}, {pipeline_mode = #tpu.pipeline_mode<synchronous>, transform_indices = @transform_5, window_bounds = array<i64: 256, 256>}, {pipeline_mode = #tpu.pipeline_mode<synchronous>, transform_indices = @transform_6, window_bounds = array<i64: 1, 256>}, {pipeline_mode = #tpu.pipeline_mode<synchronous>, transform_indices = @transform_7, window_bounds = array<i64: 1, 256>}, {pipeline_mode = #tpu.pipeline_mode<synchronous>, transform_indices = @transform_8, window_bounds = array<i64: 1, 1>}, {transform_indices = @transform_9, window_bounds = array<i64: 1, 128>}]} {
    %c0 = arith.constant 0 : index
    %c0_0 = arith.constant 0 : index
    %0 = vector.load %arg1[%c0, %c0_0] : memref<128x32xf32, #tpu.memory_space<vmem>>, vector<128x32xf32>
    %c0_1 = arith.constant 0 : index
    %c0_2 = arith.constant 0 : index
    %1 = vector.load %arg2[%c0_1, %c0_2] : memref<32x256xf32, #tpu.memory_space<vmem>>, vector<32x256xf32>
    %cst = arith.constant dense<0.000000e+00> : vector<128x256xf32>
    %2 = tpu.matmul %0, %1, %cst {dimension_numbers = #tpu.dot_dimension_numbers<[1], [0], [0], [1], [0, 0, 1, 1], [], []>} : vector<128x32xf32>, vector<32x256xf32>, vector<128x256xf32> -> vector<128x256xf32>
    %c0_3 = arith.constant 0 : index
    %c0_4 = arith.constant 0 : index
    %3 = vector.load %arg3[%c0_3, %c0_4] : memref<1x256xf32, #tpu.memory_space<vmem>>, vector<1x256xf32>
    %4 = vector.broadcast %3 : vector<1x256xf32> to vector<128x256xf32>
    %5 = arith.addf %2, %4 : vector<128x256xf32>
    %cst_5 = arith.constant 0.000000e+00 : f32
    %6 = vector.broadcast %cst_5 : f32 to vector<128x256xf32>
    %7 = arith.maximumf %5, %6 : vector<128x256xf32>
    %c0_6 = arith.constant 0 : index
    %c0_7 = arith.constant 0 : index
    %8 = vector.load %arg4[%c0_6, %c0_7] : memref<256x256xf32, #tpu.memory_space<vmem>>, vector<256x256xf32>
    %cst_8 = arith.constant dense<0.000000e+00> : vector<128x256xf32>
    %9 = tpu.matmul %7, %8, %cst_8 {dimension_numbers = #tpu.dot_dimension_numbers<[1], [0], [0], [1], [0, 0, 1, 1], [], []>} : vector<128x256xf32>, vector<256x256xf32>, vector<128x256xf32> -> vector<128x256xf32>
    %c0_9 = arith.constant 0 : index
    %c0_10 = arith.constant 0 : index
    %10 = vector.load %arg5[%c0_9, %c0_10] : memref<1x256xf32, #tpu.memory_space<vmem>>, vector<1x256xf32>
    %11 = vector.broadcast %10 : vector<1x256xf32> to vector<128x256xf32>
    %12 = arith.addf %9, %11 : vector<128x256xf32>
    %cst_11 = arith.constant 0.000000e+00 : f32
    %13 = vector.broadcast %cst_11 : f32 to vector<128x256xf32>
    %14 = arith.maximumf %12, %13 : vector<128x256xf32>
    %c0_12 = arith.constant 0 : index
    %c0_13 = arith.constant 0 : index
    %15 = vector.load %arg6[%c0_12, %c0_13] : memref<256x256xf32, #tpu.memory_space<vmem>>, vector<256x256xf32>
    %cst_14 = arith.constant dense<0.000000e+00> : vector<128x256xf32>
    %16 = tpu.matmul %14, %15, %cst_14 {dimension_numbers = #tpu.dot_dimension_numbers<[1], [0], [0], [1], [0, 0, 1, 1], [], []>} : vector<128x256xf32>, vector<256x256xf32>, vector<128x256xf32> -> vector<128x256xf32>
    %c0_15 = arith.constant 0 : index
    %c0_16 = arith.constant 0 : index
    %17 = vector.load %arg7[%c0_15, %c0_16] : memref<1x256xf32, #tpu.memory_space<vmem>>, vector<1x256xf32>
    %18 = vector.broadcast %17 : vector<1x256xf32> to vector<128x256xf32>
    %19 = arith.addf %16, %18 : vector<128x256xf32>
    %cst_17 = arith.constant 0.000000e+00 : f32
    %20 = vector.broadcast %cst_17 : f32 to vector<128x256xf32>
    %21 = arith.maximumf %19, %20 : vector<128x256xf32>
    %c0_18 = arith.constant 0 : index
    %c0_19 = arith.constant 0 : index
    %22 = vector.load %arg8[%c0_18, %c0_19] : memref<1x256xf32, #tpu.memory_space<vmem>>, vector<1x256xf32>
    %23 = vector.broadcast %22 : vector<1x256xf32> to vector<128x256xf32>
    %24 = arith.mulf %21, %23 : vector<128x256xf32>
    %cst_20 = arith.constant dense<0.000000e+00> : vector<128xf32>
    %25 = vector.multi_reduction <add>, %24, %cst_20 [1] : vector<128x256xf32> to vector<128xf32>
    %26 = vector.shape_cast %25 : vector<128xf32> to vector<1x128xf32>
    %c0_21 = arith.constant 0 : index
    %c0_22 = arith.constant 0 : index
    %27 = vector.load %arg9[%c0_21, %c0_22] : memref<1x1xf32, #tpu.memory_space<vmem>>, vector<1x1xf32>
    %28 = vector.broadcast %27 : vector<1x1xf32> to vector<1x128xf32>
    %29 = arith.addf %26, %28 : vector<1x128xf32>
    %c0_23 = arith.constant 0 : index
    %c0_24 = arith.constant 0 : index
    %30 = vector.load %arg10[%c0_23, %c0_24] : memref<1x128xf32, #tpu.memory_space<vmem>>, vector<1x128xf32>
    tpu.vector_store %arg10[%c0_23, %c0_24], %29 {strides = array<i32>} : memref<1x128xf32, #tpu.memory_space<vmem>>, vector<1x128xf32>,
    return
  }
  func.func @transform_0(%arg0: i32) -> (i32, i32) {
    %c0_i32 = arith.constant 0 : i32
    %c0_i32_0 = arith.constant 0 : i32
    return %arg0, %c0_i32 : i32, i32
  }
  func.func @transform_1(%arg0: i32) -> (i32, i32) {
    %c0_i32 = arith.constant 0 : i32
    %c0_i32_0 = arith.constant 0 : i32
    %c0_i32_1 = arith.constant 0 : i32
    return %c0_i32, %c0_i32_0 : i32, i32
  }
  func.func @transform_2(%arg0: i32) -> (i32, i32) {
    %c0_i32 = arith.constant 0 : i32
    %c0_i32_0 = arith.constant 0 : i32
    %c0_i32_1 = arith.constant 0 : i32
    return %c0_i32, %c0_i32_0 : i32, i32
  }
  func.func @transform_3(%arg0: i32) -> (i32, i32) {
    %c0_i32 = arith.constant 0 : i32
    %c0_i32_0 = arith.constant 0 : i32
    %c0_i32_1 = arith.constant 0 : i32
    return %c0_i32, %c0_i32_0 : i32, i32
  }
  func.func @transform_4(%arg0: i32) -> (i32, i32) {
    %c0_i32 = arith.constant 0 : i32
    %c0_i32_0 = arith.constant 0 : i32
    %c0_i32_1 = arith.constant 0 : i32
    return %c0_i32, %c0_i32_0 : i32, i32
  }
  func.func @transform_5(%arg0: i32) -> (i32, i32) {
    %c0_i32 = arith.constant 0 : i32
    %c0_i32_0 = arith.constant 0 : i32
    %c0_i32_1 = arith.constant 0 : i32
    return %c0_i32, %c0_i32_0 : i32, i32
  }
  func.func @transform_6(%arg0: i32) -> (i32, i32) {
    %c0_i32 = arith.constant 0 : i32
    %c0_i32_0 = arith.constant 0 : i32
    %c0_i32_1 = arith.constant 0 : i32
    return %c0_i32, %c0_i32_0 : i32, i32
  }
  func.func @transform_7(%arg0: i32) -> (i32, i32) {
    %c0_i32 = arith.constant 0 : i32
    %c0_i32_0 = arith.constant 0 : i32
    %c0_i32_1 = arith.constant 0 : i32
    return %c0_i32, %c0_i32_0 : i32, i32
  }
  func.func @transform_8(%arg0: i32) -> (i32, i32) {
    %c0_i32 = arith.constant 0 : i32
    %c0_i32_0 = arith.constant 0 : i32
    %c0_i32_1 = arith.constant 0 : i32
    return %c0_i32, %c0_i32_0 : i32, i32
  }
  func.func @transform_9(%arg0: i32) -> (i32, i32) {
    %c0_i32 = arith.constant 0 : i32
    %c0_i32_0 = arith.constant 0 : i32
    return %c0_i32, %arg0 : i32, i32
  }
}

</mosaic_0001>

<bundles_post_ra>
// kernel: tpu_custom_call.1
= control target key start
LH: loop header
LB: loop body
LE: loop exit
PB: predicated region body
PF: predicated region fallthrough
CT: control target
= control target key end

     0   :  { %s2567_s0 = inlined_call_operand.vmem [shape: f32[384,32], index: 0, kind: input, shape index: {}]   ;;  %s2568_s1 = inlined_call_operand.vmem [shape: f32[32,256], index: 1, kind: input, shape index: {}]   ;;  %s2569_s2 = inlined_call_operand.vmem [shape: f32[1,256], index: 2, kind: input, shape index: {}]   ;;  %s2570_s3 = inlined_call_operand.hbm [shape: f32[256,256], index: 3, kind: input, shape index: {}]   ;;  %s2571_s4 = inlined_call_operand.vmem [shape: f32[1,256], index: 4, kind: input, shape index: {}]   ;;  %s2572_s5 = inlined_call_operand.hbm [shape: f32[256,256], index: 5, kind: input, shape index: {}]   ;;  %s2573_s6 = inlined_call_operand.vmem [shape: f32[1,256], index: 6, kind: input, shape index: {}]   ;;  %s2574_s7 = inlined_call_operand.vmem [shape: f32[1,256], index: 7, kind: input, shape index: {}]   ;;  %s2575_s8 = inlined_call_operand.<no memory space> [shape: f32[1,1], index: 8, kind: input, shape index: {}]   ;;  %s2576_s9 = inlined_call_operand.hbm [shape: f32[1,384], index: 9, kind: output, shape index: {}]  }
   0x1   :  { %v14_v0 = vstv %s2575_s8 }
   0x2   :  { %15 = vst [vmem:[#allocation2] sm:$0x1] %v14_v0 }
   0x3   :  { %16 = vsyncpa [#allocation4], 0 }
   0x4   :  { %17 = vsyncpa [#allocation7], 0 }
   0x5   :  { %18 = vsyncpa [#allocation5], 0 }
   0x6   :  { %20 = vsyncpa [#allocation5 + $0x1], 0  ;;  %s1968_s11 = smov 0   ;;  %s1970_s12 = smov 0  }
   0x7   :  { %s1972_s13 = smov 0   ;;  %s1974_s14 = smov 0  }
   0x8 LB: > { %2581 = sst [smem:[#allocation12_spill]] %s1902_s13  ;;  %s1989_s8 = sadd.s32 4294967295, %s1906_s14   ;;  %s1906_s14 = sphi %s1974_s14, %s2598_s14   ;;  %s1902_s13 = sphi %s1972_s13, %s2595_s13   ;;  %s1898_s12 = sphi %s1970_s12, %s2597_s12   ;;  %s1894_s11 = sphi %s1968_s11, %s2596_s11  }
   0x9   : > { %s1517_s15 = sadd.s32 4294967294, %s1906_s14   ;;  %s1993_s16 = sadd.s32 1, %s1906_s14  }
   0xa   : > { %s227_s17 = sadd.s32 1, %s1902_s13  ;;  %s224_s18 = ssub.s32 %s1906_s14, %s1993_s16 }
   0xb   : > { %p237_p0 = scmp.ne.s32.totalorder %s1902_s13, %s1898_s12  ;;  %p225_p1 = scmp.eq.s32.totalorder %s224_s18, 0 }
   0xc   : > { %p238_p2 = scmp.eq.s32.totalorder %s1989_s8, 2  ;;  %p243_p3 = scmp.ne.s32.totalorder %s1898_s12, %s1894_s11 }
   0xd   : > { %p244_p4 = scmp.eq.s32.totalorder %s1517_s15, 2  ;;  %p1518_p7 = scmp.ge.s32.totalorder %s1906_s14, 1 }
   0xe   : > { %s2004_s19 = scalar_select %p225_p1, %s1902_s13, %s227_s17  }
   0xf   : > { %p2006_p5 = por %p238_p2, %p237_p0  ;;  %p2010_p6 = por %p244_p4, %p243_p3 }
  0x10   : > { %2582 = sst [smem:[#allocation13_spill]] %s2004_s19  ;;  %p251_p8 = scmp.lt.s32.totalorder %s1906_s14, 4 }
  0x11   : > { %s2583_s20 = scalar_select %p2006_p5, 1, 0 }
  0x12   : > { %s2584_s21 = scalar_select %p2010_p6, 1, 0 }
  0x13   : > { %p2577_p9 = scmp.eq.s32.totalorder %s1989_s8, 0  ;;  %p2017_p10 = pnand %p1518_p7, %p251_p8 }
  0x14   : > { %s1908_s23 = smov [#allocation3]   ;;  %s1909_s26 = smov [#allocation6]  }
  0x15   : > { %s2585_s22 = scalar_select %p2017_p10, 1, 0 }
  0x16   : > { %s269_s24 = sshll.u32 %s1908_s23, 4  ;;  %p1724_p11 = pneg %p2017_p10  ;;  %s270_s24 = int_to_ptr.vmem [resolvable:$true] %s269_s24 }
  0x17   : > { %s285_s27 = sshll.u32 %s1909_s26, 4  ;;  %s1780_s30 = scalar_lea.hbm %s2570_s3, 8192  ;;  %s2029_s27 = int_to_ptr.vmem [resolvable:$true] %s285_s27 }
  0x18   : > { %p2025_p12 = pnand %p2577_p9, %p1724_p11  ;;  %p1781_p13 = scmp.ne.s32.totalorder %s2570_s3, %s1780_s30 }
  0x19   : > { %p1787_p3 = scmp.lt.u32.totalorder %s1780_s30, %s2570_s3 }
  0x1a   : > { %p1782_p0 = pneg %p2025_p12 }
  0x1c   : > { %p1783_p1 = pnand %p1782_p0, %p1781_p13 }
  0x1e   : > { %p1784_p2 = pneg %p1783_p1 }
  0x20   : > { %p1789_p4 = pnand %p1787_p3, %p1784_p2 }
  0x22   : > { %1792 = shalt.err (!%p1789_p4)
}
  0x23   : > { %s1793_s23 = scalar_lea.vmem %s270_s24, 8192  ;;  %p1801_p9 = scmp.lt.s32.totalorder %s270_s24, %s270_s24 }
  0x24   : > { %p1794_p7 = scmp.ne.s32.totalorder %s270_s24, %s1793_s23  ;;  %p1802_p6 = scmp.lt.s32.totalorder %s1793_s23, %s1793_s23 }
  0x26   : > { %p1796_p8 = pnand %p1794_p7, %p1782_p0  ;;  %p1803_p5 = por %p1802_p6, %p1801_p9 }
  0x28   : > { %p1797_p11 = pneg %p1796_p8 }
  0x2a   : > { %p1804_p10 = pnand %p1803_p5, %p1797_p11 }
  0x2c   : > { %1807 = shalt.err (!%p1804_p10)
}
  0x2d   : > { %s1910_s26 = smov 256   ;;  %s1911_s28 = smov 16  }
  0x2e   : > { %1727 = dma.hbm_to_vmem [thread:$0]  (!%p2025_p12), %s2570_s3, 8192, %s270_s24, [#allocation4], %s1910_s26, %s1910_s26, %s1911_s28  }
  0x2f   : > { %s1808_s17 = scalar_lea.hbm %s2572_s5, 8192 }
  0x30   : > { %p1809_p13 = scmp.ne.s32.totalorder %s2572_s5, %s1808_s17  ;;  %p1815_p9 = scmp.lt.u32.totalorder %s1808_s17, %s2572_s5 }
  0x32   : > { %p1811_p5 = pnand %p1809_p13, %p1782_p0 }
  0x34   : > { %p1812_p6 = pneg %p1811_p5 }
  0x36   : > { %p1817_p10 = pnand %p1815_p9, %p1812_p6 }
  0x38   : > { %1820 = shalt.err (!%p1817_p10)
}
  0x39   : > { %s1821_s24 = scalar_lea.vmem %s2029_s27, 8192  ;;  %p1829_p4 = scmp.lt.s32.totalorder %s2029_s27, %s2029_s27 }
  0x3a   : > { %p1822_p1 = scmp.ne.s32.totalorder %s2029_s27, %s1821_s24  ;;  %p1830_p7 = scmp.lt.s32.totalorder %s1821_s24, %s1821_s24 }
  0x3c   : > { %p1824_p2 = pnand %p1822_p1, %p1782_p0  ;;  %p1831_p8 = por %p1830_p7, %p1829_p4 }
  0x3e   : > { %p1825_p3 = pneg %p1824_p2 }
  0x40   : > { %p1832_p11 = pnand %p1831_p8, %p1825_p3 }
  0x42   : > { %1835 = shalt.err (!%p1832_p11)
}
  0x43   : > { %1730 = dma.hbm_to_vmem [thread:$0]  (!%p2025_p12), %s2572_s5, 8192, %s2029_s27, [#allocation7], %s1910_s26, %s1910_s26, %s1911_s28  }
  0x44   : > { %p2587_p13 = scmp.ne.s32.totalorder %s2585_s22, 0 }
  0x45   : > { %p2588_p5 = scmp.eq.s32.totalorder (!%p2587_p13), %s1989_s8, 0 }
  0x46   : > { %319 = sbr.rel (%p2587_p13) target bundleno = 988 (0x3dc), region = 56 }
  0x4d   : > { %1881 = dma.done.wait (%p2588_p5), [#allocation4], 8192   ;;  %p2589_p0 = pmov %p2588_p5 }
  0x4f   : > { %1883 = vsyncadd (%p2589_p0), [#allocation4], 4294959104  ;;  %p2590_p6 = pmov %p2589_p0 }
  0x50   : > { %p2591_p9 = pmov %p2589_p0 }
  0x51   : > { %1885 = dma.done.wait (%p2590_p6), [#allocation7], 8192  }
  0x52   : > { %1887 = vsyncadd (%p2591_p9), [#allocation7], 4294959104  ;;  %s2089_s25 = sshll.u32 %s1989_s8, 4  ;;  %v1912_v1 = vmov 0.0   ;;  %v381_v2 = vld [vmem:[%s2568_s1 + $0x8] sm:$0xff]  ;;  %v383_v3 = vld [vmem:[%s2568_s1 + $0x18] sm:$0xff] }
  0x53   : > { %513 = vmatprep.mubr.f32.mxu0 %v1912_v1  ;;  %p359_p12 = scmp.lt.s32.totalorder %s2089_s25, 47  ;;  %v380_v4 = vld [vmem:[%s2568_s1] sm:$0xff]  ;;  %v1546_v5 = vpack.c.bf16 %v383_v3, %v381_v2  ;;  %v382_v6 = vld [vmem:[%s2568_s1 + $0x10] sm:$0xff]  ;;  %v385_v7 = vld [vmem:[%s2568_s1 + $0x28] sm:$0xff]  ;;  %vm400_vm0 = vcmask 261120   ;;  %vm1325_vm1 = vcmask 130112   ;;  %s2523_s30 = scalar_lea.hbm %s2576_s9, %s2089_s25 }
  0x54   : > { %v387_v8 = vld [vmem:[%s2568_s1 + $0x38] sm:$0xff]  ;;  %v1548_v9 = vpack.c.bf16 %v382_v6, %v380_v4  ;;  %v384_v11 = vld [vmem:[%s2568_s1 + $0x20] sm:$0xff]  ;;  %v386_v12 = vld [vmem:[%s2568_s1 + $0x30] sm:$0xff]  ;;  %vm1332_vm2 = vcmask 195712   ;;  %vm1339_vm3 = vcmask 261312   ;;  %vm1346_vm4 = vcmask 326912  }
  0x55   : > { %s360_s22 = scalar_select %p359_p12, %s2089_s25, 47  ;;  %v1550_v10 = vpack.c.bf16 %v387_v8, %v385_v7  ;;  %1547 = vmatprep.subr.bf16.mxu0 %v1546_v5  ;;  %v1552_v13 = vpack.c.bf16 %v386_v12, %v384_v11  ;;  %v643_v15 = vld [vmem:[#allocation3 + $0x8] sm:$0xff]  ;;  %v645_v16 = vld [vmem:[#allocation3 + $0x18] sm:$0xff]  ;;  %v642_v17 = vld [vmem:[#allocation3] sm:$0xff]  ;;  %vm1353_vm5 = vcmask 392512   ;;  %vm1360_vm6 = vcmask 458112  }
  0x56   : > { %1549 = vmatpush1.bf16.msra.mxu0 %v1548_v9  ;;  %v1554_v18 = vpack.c.bf16 %v645_v16, %v643_v15  ;;  %v644_v19 = vld [vmem:[#allocation3 + $0x10] sm:$0xff]  ;;  %v647_v20 = vld [vmem:[#allocation3 + $0x28] sm:$0xff]  ;;  %v649_v21 = vld [vmem:[#allocation3 + $0x38] sm:$0xff]  ;;  %vm1367_vm7 = vcmask 523712   ;;  %vm1374_vm8 = vcmask 589312   ;;  %vm1381_vm9 = vcmask 654912  }
  0x57   : > { %s1526_s13 = sshll.u32 %s360_s22, 3  ;;  %1551 = vmatprep.subr.bf16.mxu0 %v1550_v10  ;;  %v1556_v22 = vpack.c.bf16 %v644_v19, %v642_v17  ;;  %v1558_v23 = vpack.c.bf16 %v649_v21, %v647_v20  ;;  %v646_v24 = vld [vmem:[#allocation3 + $0x20] sm:$0xff]  ;;  %v648_v25 = vld [vmem:[#allocation3 + $0x30] sm:$0xff]  ;;  %v651_v26 = vld [vmem:[#allocation3 + $0x48] sm:$0xff]  ;;  %s356_s19 = sand.u32 1, %s1898_s12   ;;  %vm1388_vm10 = vcmask 720512  }
  0x58   : > { %s2121_s10 = scalar_lea.vmem %s2567_s0, %s1526_s13  ;;  %1555 = vmatprep.subr.bf16.mxu1 %v1554_v18  ;;  %v653_v27 = vld [vmem:[#allocation3 + $0x58] sm:$0xff]  ;;  %v1560_v29 = vpack.c.bf16 %v648_v25, %v646_v24  ;;  %v650_v31 = vld [vmem:[#allocation3 + $0x40] sm:$0xff]  ;;  %v652_v32 = vld [vmem:[#allocation3 + $0x50] sm:$0xff]  ;;  %vm1395_vm11 = vcmask 786112   ;;  %vm1402_vm12 = vcmask 851712   ;;  %vm1409_vm13 = vcmask 917312  }
  0x59   : > { %v364_v14 = vld [vmem:[%s2121_s10] sm:$0xff]  ;;  %v365_v28 = vld [vmem:[%s2121_s10 + $0x8] sm:$0xff]  ;;  %1557 = vmatpush1.bf16.msra.mxu1 %v1556_v22  ;;  %v1562_v30 = vpack.c.bf16 %v653_v27, %v651_v26  ;;  %v366_v35 = vld [vmem:[%s2121_s10 + $0x10] sm:$0xff]  ;;  %v1564_v36 = vpack.c.bf16 %v652_v32, %v650_v31  ;;  %vm1416_vm14 = vcmask 982912   ;;  %s357_s27 = scalar_lea.vmem [#allocation8], %s356_s19  ;;  %vm1423_vm15 = vcmask 1048512  }
  0x5a   : > { %1553 = vmatpush1.bf16.msra.mxu0 %v1552_v13  ;;  %1559 = vmatprep.subr.bf16.mxu1 %v1558_v23  ;;  %v655_v33 = vld [vmem:[#allocation3 + $0x68] sm:$0xff]  ;;  %v657_v34 = vld [vmem:[#allocation3 + $0x78] sm:$0xff]  ;;  %v654_v38 = vld [vmem:[#allocation3 + $0x60] sm:$0xff]  ;;  %s1440_s26 = sshll.u32 %s357_s27, 4  ;;  %p2592_p1 = scmp.ne.s32.totalorder %s2583_s20, 0  ;;  %s2525_s26 = int_to_ptr.vmem [resolvable:$true] %s1440_s26 }
  0x5b   : > { %v1566_v37 = vpack.c.bf16 %v657_v34, %v655_v33  ;;  %v656_v39 = vld [vmem:[#allocation3 + $0x70] sm:$0xff]  ;;  %v659_v40 = vld [vmem:[#allocation3 + $0x88] sm:$0xff]  ;;  %v661_v41 = vld [vmem:[#allocation3 + $0x98] sm:$0xff]  ;;  %s1836_s22 = scalar_lea.vmem %s2525_s26, 16  ;;  %s1914_s8 = smov [#allocation8]  }
  0x5c   : > { %v367_v42 = vld [vmem:[%s2121_s10 + $0x18] sm:$0xff]  ;;  %v1568_v43 = vpack.c.bf16 %v656_v39, %v654_v38  ;;  %v1570_v44 = vpack.c.bf16 %v661_v41, %v659_v40  ;;  %v658_v45 = vld [vmem:[#allocation3 + $0x80] sm:$0xff]  ;;  %v663_v47 = vld [vmem:[#allocation3 + $0xa8] sm:$0xff]  ;;  %p1837_p10 = scmp.ne.s32.totalorder %s2525_s26, %s1836_s22  ;;  %s1840_s15 = sshll.u32 %s1914_s8, 4  ;;  %s1841_s15 = int_to_ptr.vmem [resolvable:$false] %s1840_s15 }
  0x5d   : > { %1527 = vmatmul.mubr.msk.f32.vlgmr.msra.gmra.mrb[0].mxu0 %vm400_vm0, %v364_v14  ;;  %1561 = vmatpush1.bf16.msra.mxu1 %v1560_v29  ;;  %v660_v46 = vld [vmem:[#allocation3 + $0x90] sm:$0xff]  ;;  %v665_v48 = vld [vmem:[#allocation3 + $0xb8] sm:$0xff]  ;;  %v662_v52 = vld [vmem:[#allocation3 + $0xa0] sm:$0xff]  ;;  %s1842_s17 = scalar_lea.vmem %s1841_s15, 32  ;;  %p1843_p4 = scmp.lt.s32.totalorder %s2525_s26, %s1841_s15 }
  0x5e   : > { %519 = vmatprep.mubr.f32.mxu0 %v1912_v1  ;;  %1563 = vmatprep.subr.bf16.mxu1 %v1562_v30  ;;  %v368_v49 = vld [vmem:[%s2121_s10 + $0x20] sm:$0xff]  ;;  %v1572_v50 = vpack.c.bf16 %v660_v46, %v658_v45  ;;  %v1574_v51 = vpack.c.bf16 %v665_v48, %v663_v47  ;;  %v664_v53 = vld [vmem:[#allocation3 + $0xb0] sm:$0xff]  ;;  %v667_v54 = vld [vmem:[#allocation3 + $0xc8] sm:$0xff]  ;;  %p1838_p2 = pnand %p1837_p10, %p2592_p1  ;;  %p1844_p7 = scmp.lt.s32.totalorder %s1842_s17, %s1836_s22 }
  0x5f   : > { %v669_v55 = vld [vmem:[#allocation3 + $0xd8] sm:$0xff]  ;;  %v369_v56 = vld [vmem:[%s2121_s10 + $0x28] sm:$0xff]  ;;  %v1576_v57 = vpack.c.bf16 %v664_v53, %v662_v52  ;;  %v668_v60 = vld [vmem:[#allocation3 + $0xd0] sm:$0xff] }
  0x60   : > { %v1578_v58 = vpack.c.bf16 %v669_v55, %v667_v54  ;;  %v666_v59 = vld [vmem:[#allocation3 + $0xc0] sm:$0xff]  ;;  %v671_v61 = vld [vmem:[#allocation3 + $0xe8] sm:$0xff]  ;;  %v673_v62 = vld [vmem:[#allocation3 + $0xf8] sm:$0xff]  ;;  %p1839_p3 = pneg %p1838_p2  ;;  %p1845_p8 = por %p1844_p7, %p1843_p4 }
  0x61   : > { %1528 = vmatmul.mubr.msk.f32.gmra.mrb[2].mxu0 %vm400_vm0, %v365_v28  ;;  %1565 = vmatpush1.bf16.msra.mxu1 %v1564_v36  ;;  %v370_v63 = vld [vmem:[%s2121_s10 + $0x30] sm:$0xff]  ;;  %v1580_v0 = vpack.c.bf16 %v668_v60, %v666_v59  ;;  %v1582_v2 = vpack.c.bf16 %v673_v62, %v671_v61  ;;  %v670_v3 = vld [vmem:[#allocation3 + $0xe0] sm:$0xff]  ;;  %v677_v6 = vld [vmem:[#allocation3 + $0x118] sm:$0xff] }
  0x62   : > { %525 = vmatprep.mubr.f32.mxu0 %v1912_v1  ;;  %1567 = vmatprep.subr.bf16.mxu1 %v1566_v37  ;;  %v672_v4 = vld [vmem:[#allocation3 + $0xf0] sm:$0xff]  ;;  %v675_v5 = vld [vmem:[#allocation3 + $0x108] sm:$0xff]  ;;  %v674_v10 = vld [vmem:[#allocation3 + $0x100] sm:$0xff]  ;;  %p1846_p11 = pnand %p1845_p8, %p1839_p3 }
  0x63   : > { %v371_v7 = vld [vmem:[%s2121_s10 + $0x38] sm:$0xff]  ;;  %v1584_v8 = vpack.c.bf16 %v672_v4, %v670_v3  ;;  %v1586_v9 = vpack.c.bf16 %v677_v6, %v675_v5  ;;  %v679_v12 = vld [vmem:[#allocation3 + $0x128] sm:$0xff]  ;;  %v372_v14 = vld [vmem:[%s2121_s10 + $0x40] sm:$0xff] }
  0x64   : > { %v676_v11 = vld [vmem:[#allocation3 + $0x110] sm:$0xff]  ;;  %v681_v13 = vld [vmem:[#allocation3 + $0x138] sm:$0xff]  ;;  %v678_v17 = vld [vmem:[#allocation3 + $0x120] sm:$0xff] }
  0x65   : > { %1529 = vmatmul.mubr.msk.f32.gmra.mrb[4].mxu0 %vm400_vm0, %v366_v35  ;;  %1569 = vmatpush1.bf16.msra.mxu1 %v1568_v43  ;;  %v1588_v15 = vpack.c.bf16 %v676_v11, %v674_v10  ;;  %v1590_v16 = vpack.c.bf16 %v681_v13, %v679_v12  ;;  %v680_v18 = vld [vmem:[#allocation3 + $0x130] sm:$0xff]  ;;  %v683_v19 = vld [vmem:[#allocation3 + $0x148] sm:$0xff]  ;;  %v685_v20 = vld [vmem:[#allocation3 + $0x158] sm:$0xff] }
  0x66   : > { %531 = vmatprep.mubr.f32.mxu0 %v1912_v1  ;;  %1571 = vmatprep.subr.bf16.mxu1 %v1570_v44  ;;  %v373_v21 = vld [vmem:[%s2121_s10 + $0x48] sm:$0xff]  ;;  %v1592_v22 = vpack.c.bf16 %v680_v18, %v678_v17  ;;  %v1594_v23 = vpack.c.bf16 %v685_v20, %v683_v19  ;;  %v684_v25 = vld [vmem:[#allocation3 + $0x150] sm:$0xff]  ;;  %v689_v27 = vld [vmem:[#allocation3 + $0x178] sm:$0xff] }
  0x67   : > { %v682_v24 = vld [vmem:[#allocation3 + $0x140] sm:$0xff]  ;;  %v687_v26 = vld [vmem:[#allocation3 + $0x168] sm:$0xff]  ;;  %v688_v32 = vld [vmem:[#allocation3 + $0x170] sm:$0xff] }
  0x68   : > { %v374_v28 = vld [vmem:[%s2121_s10 + $0x50] sm:$0xff]  ;;  %v1596_v29 = vpack.c.bf16 %v684_v25, %v682_v24  ;;  %v1598_v30 = vpack.c.bf16 %v689_v27, %v687_v26  ;;  %v686_v31 = vld [vmem:[#allocation3 + $0x160] sm:$0xff]  ;;  %v693_v34 = vld [vmem:[#allocation3 + $0x198] sm:$0xff] }
  0x69   : > { %1530 = vmatmul.mubr.msk.f32.gmra.mrb[6].mxu0 %vm400_vm0, %v367_v42  ;;  %1573 = vmatpush1.bf16.msra.mxu1 %v1572_v50  ;;  %v691_v33 = vld [vmem:[#allocation3 + $0x188] sm:$0xff]  ;;  %v375_v35 = vld [vmem:[%s2121_s10 + $0x58] sm:$0xff]  ;;  %v1600_v36 = vpack.c.bf16 %v688_v32, %v686_v31  ;;  %v690_v38 = vld [vmem:[#allocation3 + $0x180] sm:$0xff] }
  0x6a   : > { %537 = vmatprep.mubr.f32.mxu0 %v1912_v1  ;;  %1575 = vmatprep.subr.bf16.mxu1 %v1574_v51  ;;  %v1602_v37 = vpack.c.bf16 %v693_v34, %v691_v33  ;;  %v692_v39 = vld [vmem:[#allocation3 + $0x190] sm:$0xff]  ;;  %v695_v40 = vld [vmem:[#allocation3 + $0x1a8] sm:$0xff]  ;;  %v697_v41 = vld [vmem:[#allocation3 + $0x1b8] sm:$0xff] }
  0x6b   : > { %v376_v42 = vld [vmem:[%s2121_s10 + $0x60] sm:$0xff]  ;;  %v1604_v43 = vpack.c.bf16 %v692_v39, %v690_v38  ;;  %v1606_v44 = vpack.c.bf16 %v697_v41, %v695_v40  ;;  %v696_v46 = vld [vmem:[#allocation3 + $0x1b0] sm:$0xff]  ;;  %v699_v47 = vld [vmem:[#allocation3 + $0x1c8] sm:$0xff] }
  0x6c   : > { %v694_v45 = vld [vmem:[#allocation3 + $0x1a0] sm:$0xff]  ;;  %v701_v48 = vld [vmem:[#allocation3 + $0x1d8] sm:$0xff]  ;;  %v378_v52 = vld [vmem:[%s2121_s10 + $0x70] sm:$0xff] }
  0x6d   : > { %1531 = vmatmul.mubr.msk.f32.gmra.mrb[8].mxu0 %vm400_vm0, %v368_v49  ;;  %1577 = vmatpush1.bf16.msra.mxu1 %v1576_v57  ;;  %v377_v49 = vld [vmem:[%s2121_s10 + $0x68] sm:$0xff]  ;;  %v1608_v50 = vpack.c.bf16 %v696_v46, %v694_v45  ;;  %v1610_v51 = vpack.c.bf16 %v701_v48, %v699_v47  ;;  %v379_v53 = vld [vmem:[%s2121_s10 + $0x78] sm:$0xff]  ;;  %s1428_s10 = scalar_lea.sflag [#allocation5], %s356_s19 }
  0x6e   : > { %543 = vmatprep.mubr.f32.mxu0 %v1912_v1  ;;  %1579 = vmatprep.subr.bf16.mxu1 %v1578_v58  ;;  %v698_v54 = vld [vmem:[#allocation3 + $0x1c0] sm:$0xff]  ;;  %v700_v55 = vld [vmem:[#allocation3 + $0x1d0] sm:$0xff]  ;;  %v703_v57 = vld [vmem:[#allocation3 + $0x1e8] sm:$0xff] }
  0x6f   : > { %v705_v58 = vld [vmem:[#allocation3 + $0x1f8] sm:$0xff]  ;;  %v702_v60 = vld [vmem:[#allocation3 + $0x1e0] sm:$0xff]  ;;  %v704_v61 = vld [vmem:[#allocation3 + $0x1f0] sm:$0xff] }
  0x70   : > { %v1614_v59 = vpack.c.bf16 %v705_v58, %v703_v57  ;;  %v1616_v62 = vpack.c.bf16 %v704_v61, %v702_v60  ;;  %v916_v4 = vld [vmem:[#allocation6 + $0x28] sm:$0xff]  ;;  %v918_v5 = vld [vmem:[#allocation6 + $0x38] sm:$0xff]  ;;  %v923_v20 = vld [vmem:[#allocation6 + $0x60] sm:$0xff] }
  0x71   : > { %1532 = vmatmul.mubr.msk.f32.gmra.mrb[10].mxu0 %vm400_vm0, %v369_v56  ;;  %1581 = vmatpush1.bf16.msra.mxu1 %v1580_v0  ;;  %v1612_v56 = vpack.c.bf16 %v700_v55, %v698_v54  ;;  %v914_v0 = vld [vmem:[#allocation6 + $0x18] sm:$0xff]  ;;  %v920_v10 = vld [vmem:[#allocation6 + $0x48] sm:$0xff]  ;;  %v927_v26 = vld [vmem:[#allocation6 + $0x80] sm:$0xff] }
  0x72   : > { %549 = vmatprep.mubr.f32.mxu0 %v1912_v1  ;;  %1583 = vmatprep.subr.bf16.mxu1 %v1582_v2  ;;  %v911_v2 = vld [vmem:[#allocation6] sm:$0xff]  ;;  %v922_v11 = vld [vmem:[#allocation6 + $0x58] sm:$0xff]  ;;  %v929_v27 = vld [vmem:[#allocation6 + $0x90] sm:$0xff] }
  0x73   : > { %v2178_v13 = vpack.c.bf16 %v922_v11, %v920_v10  ;;  %v926_v17 = vld [vmem:[#allocation6 + $0x78] sm:$0xff]  ;;  %v931_v32 = vld [vmem:[#allocation6 + $0xa0] sm:$0xff]  ;;  %v933_v33 = vld [vmem:[#allocation6 + $0xb0] sm:$0xff] }
  0x74   : > { %v936_v34 = vld [vmem:[#allocation6 + $0xc8] sm:$0xff]  ;;  %v935_v38 = vld [vmem:[#allocation6 + $0xc0] sm:$0xff]  ;;  %v937_v39 = vld [vmem:[#allocation6 + $0xd0] sm:$0xff] }
  0x75   : > { %1533 = vmatmul.mubr.msk.f32.gmra.mrb[12].mxu0 %vm400_vm0, %v370_v63  ;;  %1585 = vmatpush1.bf16.msra.mxu1 %v1584_v8  ;;  %v912_v63 = vld [vmem:[#allocation6 + $0x8] sm:$0xff]  ;;  %v915_v8 = vld [vmem:[#allocation6 + $0x20] sm:$0xff]  ;;  %v942_v41 = vld [vmem:[#allocation6 + $0xf8] sm:$0xff] }
  0x76   : > { %555 = vmatprep.mubr.f32.mxu0 %v1912_v1  ;;  %1587 = vmatprep.subr.bf16.mxu1 %v1586_v9  ;;  %v1618_v3 = vpack.c.bf16 %v914_v0, %v912_v63  ;;  %v917_v9 = vld [vmem:[#allocation6 + $0x30] sm:$0xff]  ;;  %v940_v40 = vld [vmem:[#allocation6 + $0xe8] sm:$0xff]  ;;  %v946_v47 = vld [vmem:[#allocation6 + $0x118] sm:$0xff] }
  0x77   : > { %v2175_v12 = vpack.c.bf16 %v917_v9, %v915_v8  ;;  %v941_v45 = vld [vmem:[#allocation6 + $0xf0] sm:$0xff]  ;;  %v944_v46 = vld [vmem:[#allocation6 + $0x108] sm:$0xff]  ;;  %v962_v9 = vld [vmem:[#allocation6 + $0x198] sm:$0xff] }
  0x78   : > { %1619 = vmatprep.subr.bf16.mxu0 %v1618_v3  ;;  %v949_v57 = vld [vmem:[#allocation6 + $0x130] sm:$0xff]  ;;  %v952_v58 = vld [vmem:[#allocation6 + $0x148] sm:$0xff] }
  0x79   : > { %1534 = vmatmul.mubr.msk.f32.gmra.mrb[14].mxu0 %vm400_vm0, %v371_v7  ;;  %1589 = vmatpush1.bf16.msra.mxu1 %v1588_v15  ;;  %v2172_v7 = vpack.c.bf16 %v918_v5, %v916_v4  ;;  %v921_v15 = vld [vmem:[#allocation6 + $0x50] sm:$0xff]  ;;  %v956_v0 = vld [vmem:[#allocation6 + $0x168] sm:$0xff]  ;;  %v955_v4 = vld [vmem:[#allocation6 + $0x160] sm:$0xff] }
  0x7a   : > { %561 = vmatprep.mubr.f32.mxu0 %v1912_v1  ;;  %1591 = vmatprep.subr.bf16.mxu1 %v1590_v16  ;;  %v924_v16 = vld [vmem:[#allocation6 + $0x68] sm:$0xff]  ;;  %v953_v63 = vld [vmem:[#allocation6 + $0x150] sm:$0xff] }
  0x7b   : > { %v2184_v19 = vpack.c.bf16 %v926_v17, %v924_v16  ;;  %v957_v5 = vld [vmem:[#allocation6 + $0x170] sm:$0xff]  ;;  %v960_v8 = vld [vmem:[#allocation6 + $0x188] sm:$0xff]  ;;  %v390_v16 = vlaneseq }
  0x7c   : > { %v2235_v10 = vpack.c.bf16 %v957_v5, %v955_v4  ;;  %v2238_v11 = vpack.c.bf16 %v962_v9, %v960_v8  ;;  %v964_v17 = vld [vmem:[#allocation6 + $0x1a8] sm:$0xff] }
  0x7d   : > { %1535 = vmatmul.mubr.msk.f32.gmra.mrb[16].mxu0 %vm400_vm0, %v372_v14  ;;  %1593 = vmatpush1.bf16.msra.mxu1 %v1592_v22  ;;  %v919_v14 = vld [vmem:[#allocation6 + $0x40] sm:$0xff]  ;;  %v928_v22 = vld [vmem:[#allocation6 + $0x88] sm:$0xff] }
  0x7e   : > { %567 = vmatprep.mubr.f32.mxu0 %v1912_v1  ;;  %1595 = vmatprep.subr.bf16.mxu1 %v1594_v23  ;;  %v2181_v18 = vpack.c.bf16 %v921_v15, %v919_v14  ;;  %v930_v23 = vld [vmem:[#allocation6 + $0x98] sm:$0xff]  ;;  %v959_v14 = vld [vmem:[#allocation6 + $0x180] sm:$0xff]  ;;  %v961_v15 = vld [vmem:[#allocation6 + $0x190] sm:$0xff] }
  0x7f   : > { %v2190_v25 = vpack.c.bf16 %v930_v23, %v928_v22  ;;  %v963_v23 = vld [vmem:[#allocation6 + $0x1a0] sm:$0xff] }
  0x81   : > { %1536 = vmatmul.mubr.msk.f32.gmra.mrb[18].mxu0 %vm400_vm0, %v373_v21  ;;  %1597 = vmatpush1.bf16.msra.mxu1 %v1596_v29  ;;  %v925_v21 = vld [vmem:[#allocation6 + $0x70] sm:$0xff]  ;;  %v934_v29 = vld [vmem:[#allocation6 + $0xb8] sm:$0xff] }
  0x82   : > { %573 = vmatprep.mubr.f32.mxu0 %v1912_v1  ;;  %1599 = vmatprep.subr.bf16.mxu1 %v1598_v30  ;;  %v2187_v24 = vpack.c.bf16 %v925_v21, %v923_v20  ;;  %v2193_v30 = vpack.c.bf16 %v929_v27, %v927_v26  ;;  %v966_v20 = vld [vmem:[#allocation6 + $0x1b8] sm:$0xff]  ;;  %v2241_v21 = vpack.c.bf16 %v961_v15, %v959_v14  ;;  %v965_v26 = vld [vmem:[#allocation6 + $0x1b0] sm:$0xff]  ;;  %v2247_v27 = vshrl.u32 %v390_v16, 7 }
  0x83   : > { %v2244_v22 = vpack.c.bf16 %v966_v20, %v964_v17 }
  0x85   : > { %1537 = vmatmul.mubr.msk.f32.gmra.mrb[20].mxu0 %vm400_vm0, %v374_v28  ;;  %1601 = vmatpush1.bf16.msra.mxu1 %v1600_v36  ;;  %v932_v28 = vld [vmem:[#allocation6 + $0xa8] sm:$0xff]  ;;  %v2199_v36 = vpack.c.bf16 %v933_v33, %v931_v32  ;;  %v2250_v32 = vpack.c.bf16 %v965_v26, %v963_v23 }
  0x86   : > { %579 = vmatprep.mubr.f32.mxu0 %v1912_v1  ;;  %1603 = vmatprep.subr.bf16.mxu1 %v1602_v37  ;;  %v2196_v31 = vpack.c.bf16 %v934_v29, %v932_v28  ;;  %v968_v28 = vld [vmem:[#allocation6 + $0x1c8] sm:$0xff]  ;;  %v970_v29 = vld [vmem:[#allocation6 + $0x1d8] sm:$0xff] }
  0x87   : > { %v2253_v33 = vpack.c.bf16 %v970_v29, %v968_v28 }
  0x89   : > { %1538 = vmatmul.mubr.msk.f32.gmra.mrb[22].mxu0 %vm400_vm0, %v375_v35  ;;  %1605 = vmatpush1.bf16.msra.mxu1 %v1604_v43  ;;  %v938_v35 = vld [vmem:[#allocation6 + $0xd8] sm:$0xff]  ;;  %v2208_v43 = vpack.c.bf16 %v942_v41, %v940_v40  ;;  %v2262_v40 = vsub.s32 1, %v2247_v27 }
  0x8a   : > { %585 = vmatprep.mubr.f32.mxu0 %v1912_v1  ;;  %1607 = vmatprep.subr.bf16.mxu1 %v1606_v44  ;;  %v2202_v37 = vpack.c.bf16 %v938_v35, %v936_v34  ;;  %v939_v44 = vld [vmem:[#allocation6 + $0xe0] sm:$0xff]  ;;  %v969_v35 = vld [vmem:[#allocation6 + $0x1d0] sm:$0xff] }
  0x8b   : > { %v2211_v48 = vpack.c.bf16 %v941_v45, %v939_v44  ;;  %v967_v34 = vld [vmem:[#allocation6 + $0x1c0] sm:$0xff] }
  0x8c   : > { %v2265_v41 = vpack.c.bf16 %v969_v35, %v967_v34 }
  0x8d   : > { %1539 = vmatmul.mubr.msk.f32.gmra.mrb[24].mxu0 %vm400_vm0, %v376_v42  ;;  %1609 = vmatpush1.bf16.msra.mxu1 %v1608_v50  ;;  %v2205_v42 = vpack.c.bf16 %v937_v39, %v935_v38  ;;  %v943_v50 = vld [vmem:[#allocation6 + $0x100] sm:$0xff]  ;;  %v2256_v38 = vsub.s32 0, %v2247_v27 }
  0x8e   : > { %591 = vmatprep.mubr.f32.mxu0 %v1912_v1  ;;  %1611 = vmatprep.subr.bf16.mxu1 %v1610_v51  ;;  %v945_v51 = vld [vmem:[#allocation6 + $0x110] sm:$0xff]  ;;  %v388_v39 = vld [vmem:[%s2569_s2] sm:$0x3] }
  0x8f   : > { %v2217_v54 = vpack.c.bf16 %v945_v51, %v943_v50  ;;  %v2269_v44 = vrot.slane %v388_v39, %v2256_v38  ;;  %v2272_v45 = vrot.slane %v388_v39, %v2262_v40 }
  0x91   : > { %1540 = vmatmul.mubr.msk.f32.gmra.mrb[26].mxu0 %vm400_vm0, %v377_v49  ;;  %1613 = vmatpush1.bf16.msra.mxu1 %v1612_v56  ;;  %v2214_v49 = vpack.c.bf16 %v946_v47, %v944_v46  ;;  %v947_v56 = vld [vmem:[#allocation6 + $0x120] sm:$0xff] }
  0x92   : > { %597 = vmatprep.mubr.f32.mxu0 %v1912_v1  ;;  %1615 = vmatprep.subr.bf16.mxu1 %v1614_v59  ;;  %v954_v59 = vld [vmem:[#allocation6 + $0x158] sm:$0xff]  ;;  %v2223_v60 = vpack.c.bf16 %v949_v57, %v947_v56 }
  0x93   : > { %v2226_v61 = vpack.c.bf16 %v954_v59, %v952_v58 }
  0x95   : > { %1541 = vmatmul.mubr.msk.f32.gmra.mrb[28].mxu0 %vm400_vm0, %v378_v52  ;;  %1617 = vmatpush1.bf16.msra.mxu1 %v1616_v62  ;;  %v948_v52 = vld [vmem:[#allocation6 + $0x128] sm:$0xff]  ;;  %v951_v62 = vld [vmem:[#allocation6 + $0x140] sm:$0xff] }
  0x96   : > { %603 = vmatprep.mubr.f32.mxu0 %v1912_v1  ;;  %v913_v1 = vld [vmem:[#allocation6 + $0x10] sm:$0xff]  ;;  %1682 = vmatprep.subr.bf16.mxu1 %v1618_v3  ;;  %v2229_v3 = vpack.c.bf16 %v953_v63, %v951_v62 }
  0x97   : > { %v2170_v6 = vpack.c.bf16 %v913_v1, %v911_v2  ;;  %v958_v2 = vld [vmem:[#allocation6 + $0x178] sm:$0xff] }
  0x98   : > { %v2232_v1 = vpack.c.bf16 %v958_v2, %v956_v0 }
  0x99   : > { %1542 = vmatmul.mubr.msk.f32.gmra.mrb[30].mxu0 %vm400_vm0, %v379_v53  ;;  %v950_v53 = vld [vmem:[#allocation6 + $0x138] sm:$0xff] }
  0x9a   : > { %1621 = vmatpush1.bf16.msra.mxu0 %v2170_v6  ;;  %v2220_v55 = vpack.c.bf16 %v950_v53, %v948_v52 }
  0x9b   : > { %1623 = vmatprep.subr.bf16.mxu0 %v2172_v7 }
  0x9e   : > { %1625 = vmatpush1.bf16.msra.mxu0 %v2175_v12 }
  0x9f   : > { %1627 = vmatprep.subr.bf16.mxu0 %v2178_v13 }
  0xa2   : > { %1629 = vmatpush1.bf16.msra.mxu0 %v2181_v18 }
  0xa3   : > { %1631 = vmatprep.subr.bf16.mxu0 %v2184_v19 }
  0xa6   : > { %1633 = vmatpush1.bf16.msra.mxu0 %v2187_v24 }
  0xa7   : > { %1635 = vmatprep.subr.bf16.mxu0 %v2190_v25 }
  0xaa   : > { %1637 = vmatpush1.bf16.msra.mxu0 %v2193_v30 }
  0xab   : > { %1639 = vmatprep.subr.bf16.mxu0 %v2196_v31 }
  0xae   : > { %1641 = vmatpush1.bf16.msra.mxu0 %v2199_v36 }
  0xaf   : > { %1643 = vmatprep.subr.bf16.mxu0 %v2202_v37 }
  0xb2   : > { %1645 = vmatpush1.bf16.msra.mxu0 %v2205_v42 }
  0xb3   : > { %1647 = vmatprep.subr.bf16.mxu0 %v2208_v43 }
  0xb6   : > { %1649 = vmatpush1.bf16.msra.mxu0 %v2211_v48 }
  0xb7   : > { %1651 = vmatprep.subr.bf16.mxu0 %v2214_v49 }
  0xba   : > { %1653 = vmatpush1.bf16.msra.mxu0 %v2217_v54 }
  0xbb   : > { %1655 = vmatprep.subr.bf16.mxu0 %v2220_v55 }
  0xbe   : > { %1657 = vmatpush1.bf16.msra.mxu0 %v2223_v60 }
  0xbf   : > { %1659 = vmatprep.subr.bf16.mxu0 %v2226_v61 }
  0xc2   : > { %1661 = vmatpush1.bf16.msra.mxu0 %v2229_v3 }
  0xc3   : > { %1663 = vmatprep.subr.bf16.mxu0 %v2232_v1 }
  0xc6   : > { %1665 = vmatpush1.bf16.msra.mxu0 %v2235_v10 }
  0xc7   : > { %1667 = vmatprep.subr.bf16.mxu0 %v2238_v11 }
  0xca   : > { %1669 = vmatpush1.bf16.msra.mxu0 %v2241_v21 }
  0xcb   : > { %1671 = vmatprep.subr.bf16.mxu0 %v2244_v22 }
  0xce   : > { %1673 = vmatpush1.bf16.msra.mxu0 %v2250_v32 }
  0xcf   : > { %1675 = vmatprep.subr.bf16.mxu0 %v2253_v33 }
  0xd2   : > { %1677 = vmatpush1.bf16.msra.mxu0 %v2265_v41 }
 0x130   : > { %v515_v46 = vpop.f32.mrb[0].mxu0 }
 0x131   : > { %v516_v47 = vadd.f32 %v515_v46, %v2269_v44  ;;  %v517_v50 = vpop.f32.mrb[1].mxu0 }
 0x132   : > { %v518_v51 = vadd.f32 %v517_v50, %v2272_v45 }
 0x133   : > { %v610_v56 = vmax.f32 %v516_v47, 0.0 }
 0x134   : > { %v521_v52 = vpop.f32.mrb[2].mxu0  ;;  %v611_v53 = vmax.f32 %v518_v51, 0.0 }
 0x135   : > { %v522_v57 = vadd.f32 %v521_v52, %v2269_v44  ;;  %v523_v58 = vpop.f32.mrb[3].mxu0 }
 0x136   : > { %v524_v59 = vadd.f32 %v523_v58, %v2272_v45  ;;  %782 = vmatprep.mubr.f32.mxu1 %v611_v53 }
 0x137   : > { %783 = vmatmul.mubr.f32.vlgmr.msra.gmra.mrb[0].mxu1 %v610_v56  ;;  %v612_v0 = vmax.f32 %v522_v57, 0.0 }
 0x138   : > { %v613_v62 = vmax.f32 %v524_v59, 0.0  ;;  %v527_v63 = vpop.f32.mrb[4].mxu0  ;;  %1698 = vmatpush1.bf16.msra.mxu1 %v2170_v6 }
 0x139   : > { %v528_v2 = vadd.f32 %v527_v63, %v2269_v44  ;;  %v529_v4 = vpop.f32.mrb[5].mxu0  ;;  %1683 = vmatprep.subr.bf16.mxu1 %v2172_v7 }
 0x13a   : > { %v530_v5 = vadd.f32 %v529_v4, %v2272_v45  ;;  %788 = vmatprep.mubr.f32.mxu1 %v613_v62 }
 0x13b   : > { %789 = vmatmul.mubr.f32.gmra.mrb[2].mxu1 %v612_v0  ;;  %v614_v14 = vmax.f32 %v528_v2, 0.0 }
 0x13c   : > { %v615_v8 = vmax.f32 %v530_v5, 0.0  ;;  %v533_v9 = vpop.f32.mrb[6].mxu0  ;;  %1699 = vmatpush1.bf16.msra.mxu1 %v2175_v12 }
 0x13d   : > { %v534_v15 = vadd.f32 %v533_v9, %v2269_v44  ;;  %v535_v17 = vpop.f32.mrb[7].mxu0  ;;  %1684 = vmatprep.subr.bf16.mxu1 %v2178_v13 }
 0x13e   : > { %v536_v6 = vadd.f32 %v535_v17, %v2272_v45  ;;  %794 = vmatprep.mubr.f32.mxu1 %v615_v8 }
 0x13f   : > { %795 = vmatmul.mubr.f32.gmra.mrb[4].mxu1 %v614_v14  ;;  %v616_v23 = vmax.f32 %v534_v15, 0.0 }
 0x140   : > { %v617_v20 = vmax.f32 %v536_v6, 0.0  ;;  %v539_v7 = vpop.f32.mrb[8].mxu0  ;;  %1700 = vmatpush1.bf16.msra.mxu1 %v2181_v18 }
 0x141   : > { %v540_v26 = vadd.f32 %v539_v7, %v2269_v44  ;;  %v541_v28 = vpop.f32.mrb[9].mxu0  ;;  %1685 = vmatprep.subr.bf16.mxu1 %v2184_v19 }
 0x142   : > { %v542_v12 = vadd.f32 %v541_v28, %v2272_v45  ;;  %800 = vmatprep.mubr.f32.mxu1 %v617_v20 }
 0x143   : > { %801 = vmatmul.mubr.f32.gmra.mrb[6].mxu1 %v616_v23  ;;  %v618_v34 = vmax.f32 %v540_v26, 0.0 }
 0x144   : > { %v619_v29 = vmax.f32 %v542_v12, 0.0  ;;  %v545_v13 = vpop.f32.mrb[10].mxu0  ;;  %1701 = vmatpush1.bf16.msra.mxu1 %v2187_v24 }
 0x145   : > { %v546_v35 = vadd.f32 %v545_v13, %v2269_v44  ;;  %v547_v39 = vpop.f32.mrb[11].mxu0  ;;  %1686 = vmatprep.subr.bf16.mxu1 %v2190_v25 }
 0x146   : > { %v548_v18 = vadd.f32 %v547_v39, %v2272_v45  ;;  %806 = vmatprep.mubr.f32.mxu1 %v619_v29 }
 0x147   : > { %807 = vmatmul.mubr.f32.gmra.mrb[8].mxu1 %v618_v34  ;;  %v620_v47 = vmax.f32 %v546_v35, 0.0 }
 0x148   : > { %v621_v46 = vmax.f32 %v548_v18, 0.0  ;;  %v551_v19 = vpop.f32.mrb[12].mxu0  ;;  %1702 = vmatpush1.bf16.msra.mxu1 %v2193_v30 }
 0x149   : > { %v552_v50 = vadd.f32 %v551_v19, %v2269_v44  ;;  %v553_v51 = vpop.f32.mrb[13].mxu0  ;;  %1687 = vmatprep.subr.bf16.mxu1 %v2196_v31 }
 0x14a   : > { %v554_v24 = vadd.f32 %v553_v51, %v2272_v45  ;;  %812 = vmatprep.mubr.f32.mxu1 %v621_v46 }
 0x14b   : > { %v622_v52 = vmax.f32 %v552_v50, 0.0  ;;  %813 = vmatmul.mubr.f32.gmra.mrb[10].mxu1 %v620_v47 }
 0x14c   : > { %v623_v25 = vmax.f32 %v554_v24, 0.0  ;;  %v557_v53 = vpop.f32.mrb[14].mxu0  ;;  %1703 = vmatpush1.bf16.msra.mxu1 %v2199_v36 }
 0x14d   : > { %v558_v56 = vadd.f32 %v557_v53, %v2269_v44  ;;  %v559_v57 = vpop.f32.mrb[15].mxu0  ;;  %1688 = vmatprep.subr.bf16.mxu1 %v2202_v37  ;;  %v974_v53 = vld [vmem:[#allocation6 + $0x1f8] sm:$0xff] }
 0x14e   : > { %v560_v30 = vadd.f32 %v559_v57, %v2272_v45  ;;  %818 = vmatprep.mubr.f32.mxu1 %v623_v25  ;;  %v972_v25 = vld [vmem:[#allocation6 + $0x1e8] sm:$0xff]  ;;  %v971_v57 = vld [vmem:[#allocation6 + $0x1e0] sm:$0xff] }
 0x14f   : > { %v624_v58 = vmax.f32 %v558_v56, 0.0  ;;  %819 = vmatmul.mubr.f32.gmra.mrb[12].mxu1 %v622_v52  ;;  %v1678_v56 = vpack.c.bf16 %v974_v53, %v972_v25 }
 0x150   : > { %v625_v31 = vmax.f32 %v560_v30, 0.0  ;;  %v563_v59 = vpop.f32.mrb[16].mxu0  ;;  %1704 = vmatpush1.bf16.msra.mxu1 %v2205_v42 }
 0x151   : > { %v564_v62 = vadd.f32 %v563_v59, %v2269_v44  ;;  %v565_v63 = vpop.f32.mrb[17].mxu0  ;;  %1689 = vmatprep.subr.bf16.mxu1 %v2208_v43  ;;  %1679 = vmatprep.subr.bf16.mxu0 %v1678_v56 }
 0x152   : > { %v566_v36 = vadd.f32 %v565_v63, %v2272_v45  ;;  %824 = vmatprep.mubr.f32.mxu1 %v625_v31 }
 0x153   : > { %v626_v0 = vmax.f32 %v564_v62, 0.0  ;;  %825 = vmatmul.mubr.f32.gmra.mrb[14].mxu1 %v624_v58 }
 0x154   : > { %v627_v37 = vmax.f32 %v566_v36, 0.0  ;;  %v569_v2 = vpop.f32.mrb[18].mxu0  ;;  %1705 = vmatpush1.bf16.msra.mxu1 %v2211_v48 }
 0x155   : > { %v570_v4 = vadd.f32 %v569_v2, %v2269_v44  ;;  %v571_v5 = vpop.f32.mrb[19].mxu0  ;;  %1690 = vmatprep.subr.bf16.mxu1 %v2214_v49 }
 0x156   : > { %v572_v42 = vadd.f32 %v571_v5, %v2272_v45  ;;  %830 = vmatprep.mubr.f32.mxu1 %v627_v37 }
 0x157   : > { %v628_v8 = vmax.f32 %v570_v4, 0.0  ;;  %831 = vmatmul.mubr.f32.gmra.mrb[16].mxu1 %v626_v0 }
 0x158   : > { %v629_v43 = vmax.f32 %v572_v42, 0.0  ;;  %v575_v9 = vpop.f32.mrb[20].mxu0  ;;  %1706 = vmatpush1.bf16.msra.mxu1 %v2217_v54 }
 0x159   : > { %v576_v14 = vadd.f32 %v575_v9, %v2269_v44  ;;  %v577_v15 = vpop.f32.mrb[21].mxu0  ;;  %1691 = vmatprep.subr.bf16.mxu1 %v2220_v55 }
 0x15a   : > { %v578_v48 = vadd.f32 %v577_v15, %v2272_v45  ;;  %836 = vmatprep.mubr.f32.mxu1 %v629_v43 }
 0x15b   : > { %v630_v17 = vmax.f32 %v576_v14, 0.0  ;;  %837 = vmatmul.mubr.f32.gmra.mrb[18].mxu1 %v628_v8 }
 0x15c   : > { %v631_v49 = vmax.f32 %v578_v48, 0.0  ;;  %v581_v6 = vpop.f32.mrb[22].mxu0  ;;  %1707 = vmatpush1.bf16.msra.mxu1 %v2223_v60 }
 0x15d   : > { %v582_v20 = vadd.f32 %v581_v6, %v2269_v44  ;;  %v583_v7 = vpop.f32.mrb[23].mxu0  ;;  %1692 = vmatprep.subr.bf16.mxu1 %v2226_v61 }
 0x15e   : > { %v584_v54 = vadd.f32 %v583_v7, %v2272_v45  ;;  %842 = vmatprep.mubr.f32.mxu1 %v631_v49 }
 0x15f   : > { %v632_v23 = vmax.f32 %v582_v20, 0.0  ;;  %843 = vmatmul.mubr.f32.gmra.mrb[20].mxu1 %v630_v17 }
 0x160   : > { %v633_v55 = vmax.f32 %v584_v54, 0.0  ;;  %v587_v26 = vpop.f32.mrb[24].mxu0  ;;  %1708 = vmatpush1.bf16.msra.mxu1 %v2229_v3 }
 0x161   : > { %v588_v28 = vadd.f32 %v587_v26, %v2269_v44  ;;  %v589_v12 = vpop.f32.mrb[25].mxu0  ;;  %1693 = vmatprep.subr.bf16.mxu1 %v2232_v1 }
 0x162   : > { %v590_v60 = vadd.f32 %v589_v12, %v2272_v45  ;;  %848 = vmatprep.mubr.f32.mxu1 %v633_v55 }
 0x163   : > { %v634_v29 = vmax.f32 %v588_v28, 0.0  ;;  %849 = vmatmul.mubr.f32.gmra.mrb[22].mxu1 %v632_v23 }
 0x164   : > { %v635_v61 = vmax.f32 %v590_v60, 0.0  ;;  %v593_v13 = vpop.f32.mrb[26].mxu0  ;;  %1709 = vmatpush1.bf16.msra.mxu1 %v2235_v10 }
 0x165   : > { %v594_v34 = vadd.f32 %v593_v13, %v2269_v44  ;;  %v595_v35 = vpop.f32.mrb[27].mxu0  ;;  %1694 = vmatprep.subr.bf16.mxu1 %v2238_v11 }
 0x166   : > { %v596_v3 = vadd.f32 %v595_v35, %v2272_v45  ;;  %854 = vmatprep.mubr.f32.mxu1 %v635_v61 }
 0x167   : > { %v636_v39 = vmax.f32 %v594_v34, 0.0  ;;  %855 = vmatmul.mubr.f32.gmra.mrb[24].mxu1 %v634_v29 }
 0x168   : > { %v637_v1 = vmax.f32 %v596_v3, 0.0  ;;  %v599_v18 = vpop.f32.mrb[28].mxu0  ;;  %1710 = vmatpush1.bf16.msra.mxu1 %v2241_v21 }
 0x169   : > { %v600_v46 = vadd.f32 %v599_v18, %v2269_v44  ;;  %v601_v19 = vpop.f32.mrb[29].mxu0  ;;  %1695 = vmatprep.subr.bf16.mxu1 %v2244_v22 }
 0x16a   : > { %v602_v10 = vadd.f32 %v601_v19, %v2272_v45  ;;  %860 = vmatprep.mubr.f32.mxu1 %v637_v1 }
 0x16b   : > { %v638_v47 = vmax.f32 %v600_v46, 0.0  ;;  %861 = vmatmul.mubr.f32.gmra.mrb[26].mxu1 %v636_v39 }
 0x16c   : > { %v639_v11 = vmax.f32 %v602_v10, 0.0  ;;  %v605_v50 = vpop.f32.mrb[30].mxu0  ;;  %1711 = vmatpush1.bf16.msra.mxu1 %v2250_v32  ;;  %v973_v32 = vld [vmem:[#allocation6 + $0x1f0] sm:$0xff] }
 0x16d   : > { %v606_v51 = vadd.f32 %v605_v50, %v2269_v44  ;;  %v607_v24 = vpop.f32.mrb[31].mxu0  ;;  %1696 = vmatprep.subr.bf16.mxu1 %v2253_v33  ;;  %v1680_v30 = vpack.c.bf16 %v973_v32, %v971_v57  ;;  %v706_v33 = vld [vmem:[%s2571_s4] sm:$0x3] }
 0x16e   : > { %v608_v21 = vadd.f32 %v607_v24, %v2272_v45  ;;  %866 = vmatprep.mubr.f32.mxu1 %v639_v11  ;;  %v2340_v44 = vrot.slane %v706_v33, %v2256_v38 }
 0x16f   : > { %v640_v52 = vmax.f32 %v606_v51, 0.0  ;;  %867 = vmatmul.mubr.f32.gmra.mrb[28].mxu1 %v638_v47  ;;  %1681 = vmatpush1.bf16.msra.mxu0 %v1680_v30 }
 0x170   : > { %v641_v22 = vmax.f32 %v608_v21, 0.0  ;;  %1712 = vmatpush1.bf16.msra.mxu1 %v2265_v41  ;;  %v2343_v41 = vrot.slane %v706_v33, %v2262_v40 }
 0x171   : > { %1697 = vmatprep.subr.bf16.mxu1 %v1678_v56 }
 0x172   : > { %872 = vmatprep.mubr.f32.mxu1 %v641_v22 }
 0x173   : > { %873 = vmatmul.mubr.f32.gmra.mrb[30].mxu1 %v640_v52 }
 0x174   : > { %1713 = vmatpush1.bf16.msra.mxu1 %v1680_v30 }
 0x20a   : > { %v784_v45 = vpop.f32.mrb[0].mxu1 }
 0x20b   : > { %v785_v58 = vadd.f32 %v784_v45, %v2340_v44  ;;  %v786_v31 = vpop.f32.mrb[1].mxu1 }
 0x20c   : > { %v787_v59 = vadd.f32 %v786_v31, %v2343_v41 }
 0x20d   : > { %v879_v36 = vmax.f32 %v785_v58, 0.0 }
 0x20e   : > { %v880_v62 = vmax.f32 %v787_v59, 0.0  ;;  %v790_v63 = vpop.f32.mrb[2].mxu1 }
 0x20f   : > { %v791_v0 = vadd.f32 %v790_v63, %v2340_v44  ;;  %v792_v37 = vpop.f32.mrb[3].mxu1 }
 0x210   : > { %v793_v2 = vadd.f32 %v792_v37, %v2343_v41  ;;  %1051 = vmatprep.mubr.f32.mxu0 %v880_v62 }
 0x211   : > { %1052 = vmatmul.mubr.f32.vlgmr.msra.gmra.mrb[32].mxu0 %v879_v36  ;;  %v881_v42 = vmax.f32 %v791_v0, 0.0 }
 0x212   : > { %v882_v4 = vmax.f32 %v793_v2, 0.0  ;;  %v796_v5 = vpop.f32.mrb[4].mxu1 }
 0x213   : > { %v797_v8 = vadd.f32 %v796_v5, %v2340_v44  ;;  %v798_v43 = vpop.f32.mrb[5].mxu1 }
 0x214   : > { %v799_v9 = vadd.f32 %v798_v43, %v2343_v41  ;;  %1057 = vmatprep.mubr.f32.mxu0 %v882_v4 }
 0x215   : > { %1058 = vmatmul.mubr.f32.gmra.mrb[34].mxu0 %v881_v42  ;;  %v883_v48 = vmax.f32 %v797_v8, 0.0 }
 0x216   : > { %v884_v14 = vmax.f32 %v799_v9, 0.0  ;;  %v802_v15 = vpop.f32.mrb[6].mxu1 }
 0x217   : > { %v803_v17 = vadd.f32 %v802_v15, %v2340_v44  ;;  %v804_v49 = vpop.f32.mrb[7].mxu1 }
 0x218   : > { %v805_v6 = vadd.f32 %v804_v49, %v2343_v41  ;;  %1063 = vmatprep.mubr.f32.mxu0 %v884_v14 }
 0x219   : > { %1064 = vmatmul.mubr.f32.gmra.mrb[36].mxu0 %v883_v48  ;;  %v885_v54 = vmax.f32 %v803_v17, 0.0 }
 0x21a   : > { %v886_v20 = vmax.f32 %v805_v6, 0.0  ;;  %v808_v7 = vpop.f32.mrb[8].mxu1 }
 0x21b   : > { %v809_v23 = vadd.f32 %v808_v7, %v2340_v44  ;;  %v810_v55 = vpop.f32.mrb[9].mxu1 }
 0x21c   : > { %v811_v26 = vadd.f32 %v810_v55, %v2343_v41  ;;  %1069 = vmatprep.mubr.f32.mxu0 %v886_v20 }
 0x21d   : > { %1070 = vmatmul.mubr.f32.gmra.mrb[38].mxu0 %v885_v54  ;;  %v887_v60 = vmax.f32 %v809_v23, 0.0 }
 0x21e   : > { %v888_v28 = vmax.f32 %v811_v26, 0.0  ;;  %v814_v12 = vpop.f32.mrb[10].mxu1 }
 0x21f   : > { %v815_v29 = vadd.f32 %v814_v12, %v2340_v44  ;;  %v816_v61 = vpop.f32.mrb[11].mxu1 }
 0x220   : > { %v817_v13 = vadd.f32 %v816_v61, %v2343_v41  ;;  %1075 = vmatprep.mubr.f32.mxu0 %v888_v28 }
 0x221   : > { %1076 = vmatmul.mubr.f32.gmra.mrb[40].mxu0 %v887_v60  ;;  %v889_v3 = vmax.f32 %v815_v29, 0.0 }
 0x222   : > { %v890_v34 = vmax.f32 %v817_v13, 0.0  ;;  %v820_v35 = vpop.f32.mrb[12].mxu1 }
 0x223   : > { %v821_v39 = vadd.f32 %v820_v35, %v2340_v44  ;;  %v822_v1 = vpop.f32.mrb[13].mxu1 }
 0x224   : > { %v823_v18 = vadd.f32 %v822_v1, %v2343_v41  ;;  %1081 = vmatprep.mubr.f32.mxu0 %v890_v34  ;;  %v1913_v1 = vmov 0  }
 0x225   : > { %v891_v46 = vmax.f32 %v821_v39, 0.0  ;;  %1082 = vmatmul.mubr.f32.gmra.mrb[42].mxu0 %v889_v3  ;;  %1778 = vset.pattern.permute.xlu1 %v1913_v1 }
 0x226   : > { %v892_v19 = vmax.f32 %v823_v18, 0.0  ;;  %v826_v10 = vpop.f32.mrb[14].mxu1  ;;  %1779 = vset.pattern.permute.xlu0 %v1913_v1  ;;  %v975_v18 = vld [vmem:[%s2573_s6] sm:$0x3] }
 0x227   : > { %v827_v47 = vadd.f32 %v826_v10, %v2340_v44  ;;  %v828_v11 = vpop.f32.mrb[15].mxu1 }
 0x228   : > { %v829_v50 = vadd.f32 %v828_v11, %v2343_v41  ;;  %1087 = vmatprep.mubr.f32.mxu0 %v892_v19 }
 0x229   : > { %v893_v51 = vmax.f32 %v827_v47, 0.0  ;;  %1088 = vmatmul.mubr.f32.gmra.mrb[44].mxu0 %v891_v46  ;;  %v2381_v46 = vrot.slane %v975_v18, %v2256_v38 }
 0x22a   : > { %v894_v24 = vmax.f32 %v829_v50, 0.0  ;;  %v832_v21 = vpop.f32.mrb[16].mxu1 }
 0x22b   : > { %v833_v52 = vadd.f32 %v832_v21, %v2340_v44  ;;  %v834_v22 = vpop.f32.mrb[17].mxu1 }
 0x22c   : > { %v835_v25 = vadd.f32 %v834_v22, %v2343_v41  ;;  %1093 = vmatprep.mubr.f32.mxu0 %v894_v24 }
 0x22d   : > { %v895_v53 = vmax.f32 %v833_v52, 0.0  ;;  %1094 = vmatmul.mubr.f32.gmra.mrb[46].mxu0 %v893_v51 }
 0x22e   : > { %v896_v56 = vmax.f32 %v835_v25, 0.0  ;;  %v838_v57 = vpop.f32.mrb[18].mxu1 }
 0x22f   : > { %v839_v32 = vadd.f32 %v838_v57, %v2340_v44  ;;  %v840_v30 = vpop.f32.mrb[19].mxu1 }
 0x230   : > { %v841_v33 = vadd.f32 %v840_v30, %v2343_v41  ;;  %1099 = vmatprep.mubr.f32.mxu0 %v896_v56 }
 0x231   : > { %v897_v45 = vmax.f32 %v839_v32, 0.0  ;;  %1100 = vmatmul.mubr.f32.gmra.mrb[48].mxu0 %v895_v53 }
 0x232   : > { %v898_v58 = vmax.f32 %v841_v33, 0.0  ;;  %v844_v31 = vpop.f32.mrb[20].mxu1 }
 0x233   : > { %v845_v59 = vadd.f32 %v844_v31, %v2340_v44  ;;  %v846_v62 = vpop.f32.mrb[21].mxu1 }
 0x234   : > { %v847_v63 = vadd.f32 %v846_v62, %v2343_v41  ;;  %1105 = vmatprep.mubr.f32.mxu0 %v898_v58 }
 0x235   : > { %v899_v36 = vmax.f32 %v845_v59, 0.0  ;;  %1106 = vmatmul.mubr.f32.gmra.mrb[50].mxu0 %v897_v45 }
 0x236   : > { %v900_v0 = vmax.f32 %v847_v63, 0.0  ;;  %v850_v37 = vpop.f32.mrb[22].mxu1 }
 0x237   : > { %v851_v2 = vadd.f32 %v850_v37, %v2340_v44  ;;  %v852_v4 = vpop.f32.mrb[23].mxu1 }
 0x238   : > { %v853_v5 = vadd.f32 %v852_v4, %v2343_v41  ;;  %1111 = vmatprep.mubr.f32.mxu0 %v900_v0 }
 0x239   : > { %v901_v42 = vmax.f32 %v851_v2, 0.0  ;;  %1112 = vmatmul.mubr.f32.gmra.mrb[52].mxu0 %v899_v36 }
 0x23a   : > { %v902_v8 = vmax.f32 %v853_v5, 0.0  ;;  %v856_v43 = vpop.f32.mrb[24].mxu1 }
 0x23b   : > { %v857_v9 = vadd.f32 %v856_v43, %v2340_v44  ;;  %v858_v14 = vpop.f32.mrb[25].mxu1 }
 0x23c   : > { %v859_v15 = vadd.f32 %v858_v14, %v2343_v41  ;;  %1117 = vmatprep.mubr.f32.mxu0 %v902_v8 }
 0x23d   : > { %v903_v48 = vmax.f32 %v857_v9, 0.0  ;;  %1118 = vmatmul.mubr.f32.gmra.mrb[54].mxu0 %v901_v42 }
 0x23e   : > { %v904_v17 = vmax.f32 %v859_v15, 0.0  ;;  %v862_v49 = vpop.f32.mrb[26].mxu1 }
 0x23f   : > { %v863_v6 = vadd.f32 %v862_v49, %v2340_v44  ;;  %v864_v20 = vpop.f32.mrb[27].mxu1 }
 0x240   : > { %v865_v7 = vadd.f32 %v864_v20, %v2343_v41  ;;  %1123 = vmatprep.mubr.f32.mxu0 %v904_v17 }
 0x241   : > { %v905_v54 = vmax.f32 %v863_v6, 0.0  ;;  %1124 = vmatmul.mubr.f32.gmra.mrb[56].mxu0 %v903_v48 }
 0x242   : > { %v906_v23 = vmax.f32 %v865_v7, 0.0  ;;  %v868_v55 = vpop.f32.mrb[28].mxu1 }
 0x243   : > { %v869_v26 = vadd.f32 %v868_v55, %v2340_v44  ;;  %v870_v28 = vpop.f32.mrb[29].mxu1 }
 0x244   : > { %v871_v12 = vadd.f32 %v870_v28, %v2343_v41  ;;  %1129 = vmatprep.mubr.f32.mxu0 %v906_v23 }
 0x245   : > { %v907_v60 = vmax.f32 %v869_v26, 0.0  ;;  %1130 = vmatmul.mubr.f32.gmra.mrb[58].mxu0 %v905_v54 }
 0x246   : > { %v908_v29 = vmax.f32 %v871_v12, 0.0  ;;  %v874_v61 = vpop.f32.mrb[30].mxu1 }
 0x247   : > { %v875_v13 = vadd.f32 %v874_v61, %v2340_v44  ;;  %v876_v34 = vpop.f32.mrb[31].mxu1  ;;  %v2384_v44 = vrot.slane %v975_v18, %v2262_v40 }
 0x248   : > { %v877_v35 = vadd.f32 %v876_v34, %v2343_v41  ;;  %1135 = vmatprep.mubr.f32.mxu0 %v908_v29  ;;  %v1180_v41 = vld [vmem:[%s2574_s7] sm:$0x3] }
 0x249   : > { %v909_v3 = vmax.f32 %v875_v13, 0.0  ;;  %1136 = vmatmul.mubr.f32.gmra.mrb[60].mxu0 %v907_v60  ;;  %v2391_v11 = vrot.slane %v1180_v41, %v2256_v38  ;;  %v2395_v51 = vrot.slane %v1180_v41, %v2262_v40 }
 0x24a   : > { %v910_v39 = vmax.f32 %v877_v35, 0.0 }
 0x24c   : > { %1141 = vmatprep.mubr.f32.mxu1 %v910_v39 }
 0x24d   : > { %1142 = vmatmul.mubr.f32.vlgmr.msra.gmra.mrb[32].mxu1 %v909_v3 }
 0x2e4   : > { %v1053_v19 = vpop.f32.mrb[32].mxu0 }
 0x2e5   : > { %v1054_v10 = vadd.f32 %v1053_v19, %v2381_v46  ;;  %v1055_v47 = vpop.f32.mrb[33].mxu0 }
 0x2e6   : > { %v1056_v50 = vadd.f32 %v1055_v47, %v2384_v44 }
 0x2e7   : > { %v1148_v24 = vmax.f32 %v1054_v10, 0.0 }
 0x2e8   : > { %v1149_v21 = vmax.f32 %v1056_v50, 0.0  ;;  %v1059_v52 = vpop.f32.mrb[34].mxu0 }
 0x2e9   : > { %v1060_v22 = vadd.f32 %v1059_v52, %v2381_v46  ;;  %v1061_v25 = vpop.f32.mrb[35].mxu0  ;;  %v1192_v53 = vmul.f32 %v2391_v11, %v1148_v24 }
 0x2ea   : > { %v1062_v56 = vadd.f32 %v1061_v25, %v2384_v44  ;;  %v1193_v57 = vmul.f32 %v2395_v51, %v1149_v21 }
 0x2eb   : > { %v1150_v32 = vmax.f32 %v1060_v22, 0.0 }
 0x2ec   : > { %v1151_v30 = vmax.f32 %v1062_v56, 0.0  ;;  %v1065_v33 = vpop.f32.mrb[36].mxu0  ;;  %v1224_v45 = vadd.f32 %v1193_v57, %v1192_v53 }
 0x2ed   : > { %v1194_v58 = vmul.f32 %v2391_v11, %v1150_v32  ;;  %v1066_v40 = vadd.f32 %v1065_v33, %v2381_v46  ;;  %v1067_v31 = vpop.f32.mrb[37].mxu0 }
 0x2ee   : > { %v1195_v59 = vmul.f32 %v2395_v51, %v1151_v30  ;;  %v1068_v62 = vadd.f32 %v1067_v31, %v2384_v44  ;;  %1225 = vadd.xlane.f32.xlu0 %v1224_v45 }
 0x2ef   : > { %v1152_v63 = vmax.f32 %v1066_v40, 0.0 }
 0x2f0   : > { %v1153_v36 = vmax.f32 %v1068_v62, 0.0  ;;  %v1071_v0 = vpop.f32.mrb[38].mxu0  ;;  %v1227_v37 = vadd.f32 %v1195_v59, %v1194_v58 }
 0x2f1   : > { %v1072_v2 = vadd.f32 %v1071_v0, %v2381_v46  ;;  %v1073_v4 = vpop.f32.mrb[39].mxu0  ;;  %v1196_v5 = vmul.f32 %v2391_v11, %v1152_v63 }
 0x2f2   : > { %v1074_v42 = vadd.f32 %v1073_v4, %v2384_v44  ;;  %1228 = vadd.xlane.f32.xlu0 %v1227_v37  ;;  %v1197_v8 = vmul.f32 %v2395_v51, %v1153_v36 }
 0x2f3   : > { %v1154_v43 = vmax.f32 %v1072_v2, 0.0 }
 0x2f4   : > { %v1155_v9 = vmax.f32 %v1074_v42, 0.0  ;;  %v1077_v14 = vpop.f32.mrb[40].mxu0  ;;  %v1230_v15 = vadd.f32 %v1197_v8, %v1196_v5 }
 0x2f5   : > { %v1198_v48 = vmul.f32 %v2391_v11, %v1154_v43  ;;  %v1078_v17 = vadd.f32 %v1077_v14, %v2381_v46  ;;  %v1079_v49 = vpop.f32.mrb[41].mxu0 }
 0x2f6   : > { %v1199_v6 = vmul.f32 %v2395_v51, %v1155_v9  ;;  %v1080_v20 = vadd.f32 %v1079_v49, %v2384_v44  ;;  %1231 = vadd.xlane.f32.xlu1 %v1230_v15 }
 0x2f7   : > { %v1156_v7 = vmax.f32 %v1078_v17, 0.0 }
 0x2f8   : > { %v1157_v54 = vmax.f32 %v1080_v20, 0.0  ;;  %v1083_v23 = vpop.f32.mrb[42].mxu0  ;;  %v1233_v55 = vadd.f32 %v1199_v6, %v1198_v48 }
 0x2f9   : > { %v1200_v26 = vmul.f32 %v2391_v11, %v1156_v7  ;;  %v1084_v28 = vadd.f32 %v1083_v23, %v2381_v46  ;;  %v1085_v12 = vpop.f32.mrb[43].mxu0 }
 0x2fa   : > { %v1201_v60 = vmul.f32 %v2395_v51, %v1157_v54  ;;  %v1086_v29 = vadd.f32 %v1085_v12, %v2384_v44  ;;  %1234 = vadd.xlane.f32.xlu1 %v1233_v55  ;;  %v1272_v54 = vld [vmem:[#allocation2] sm:$0x1] }
 0x2fb   : > { %v1158_v61 = vmax.f32 %v1084_v28, 0.0 }
 0x2fc   : > { %v1159_v13 = vmax.f32 %v1086_v29, 0.0  ;;  %v1089_v34 = vpop.f32.mrb[44].mxu0  ;;  %v1236_v35 = vadd.f32 %v1201_v60, %v1200_v26 }
 0x2fd   : > { %v1202_v3 = vmul.f32 %v2391_v11, %v1158_v61  ;;  %v1090_v39 = vadd.f32 %v1089_v34, %v2381_v46  ;;  %v1091_v1 = vpop.f32.mrb[45].mxu0 }
 0x2fe   : > { %v1203_v18 = vmul.f32 %v2395_v51, %v1159_v13  ;;  %v1092_v41 = vadd.f32 %v1091_v1, %v2384_v44  ;;  %1237 = vadd.xlane.f32.xlu0 %v1236_v35 }
 0x2ff   : > { %v1160_v19 = vmax.f32 %v1090_v39, 0.0 }
 0x300   : > { %v1161_v10 = vmax.f32 %v1092_v41, 0.0  ;;  %v1095_v47 = vpop.f32.mrb[46].mxu0  ;;  %v1239_v50 = vadd.f32 %v1203_v18, %v1202_v3 }
 0x301   : > { %v1204_v24 = vmul.f32 %v2391_v11, %v1160_v19  ;;  %v1096_v21 = vadd.f32 %v1095_v47, %v2381_v46  ;;  %v1097_v52 = vpop.f32.mrb[47].mxu0 }
 0x302   : > { %v1205_v22 = vmul.f32 %v2395_v51, %v1161_v10  ;;  %v1098_v25 = vadd.f32 %v1097_v52, %v2384_v44  ;;  %1240 = vadd.xlane.f32.xlu1 %v1239_v50 }
 0x303   : > { %v1162_v53 = vmax.f32 %v1096_v21, 0.0 }
 0x304   : > { %v1163_v56 = vmax.f32 %v1098_v25, 0.0  ;;  %v1101_v57 = vpop.f32.mrb[48].mxu0  ;;  %v1242_v32 = vadd.f32 %v1205_v22, %v1204_v24 }
 0x305   : > { %v1206_v30 = vmul.f32 %v2391_v11, %v1162_v53  ;;  %v1102_v33 = vadd.f32 %v1101_v57, %v2381_v46  ;;  %v1103_v45 = vpop.f32.mrb[49].mxu0 }
 0x306   : > { %v1207_v58 = vmul.f32 %v2395_v51, %v1163_v56  ;;  %v1104_v40 = vadd.f32 %v1103_v45, %v2384_v44  ;;  %1243 = vadd.xlane.f32.xlu0 %v1242_v32 }
 0x307   : > { %v1164_v31 = vmax.f32 %v1102_v33, 0.0 }
 0x308   : > { %v1165_v59 = vmax.f32 %v1104_v40, 0.0  ;;  %v1107_v62 = vpop.f32.mrb[50].mxu0  ;;  %v1245_v63 = vadd.f32 %v1207_v58, %v1206_v30 }
 0x309   : > { %v1208_v36 = vmul.f32 %v2391_v11, %v1164_v31  ;;  %v1108_v0 = vadd.f32 %v1107_v62, %v2381_v46  ;;  %v1109_v37 = vpop.f32.mrb[51].mxu0 }
 0x30a   : > { %v1209_v2 = vmul.f32 %v2395_v51, %v1165_v59  ;;  %v1110_v4 = vadd.f32 %v1109_v37, %v2384_v44  ;;  %1246 = vadd.xlane.f32.xlu0 %v1245_v63 }
 0x30b   : > { %v1166_v5 = vmax.f32 %v1108_v0, 0.0 }
 0x30c   : > { %v1167_v42 = vmax.f32 %v1110_v4, 0.0  ;;  %v1113_v8 = vpop.f32.mrb[52].mxu0  ;;  %v1248_v43 = vadd.f32 %v1209_v2, %v1208_v36 }
 0x30d   : > { %v1210_v9 = vmul.f32 %v2391_v11, %v1166_v5  ;;  %v1114_v14 = vadd.f32 %v1113_v8, %v2381_v46  ;;  %v1115_v15 = vpop.f32.mrb[53].mxu0 }
 0x30e   : > { %v1211_v48 = vmul.f32 %v2395_v51, %v1167_v42  ;;  %v1116_v17 = vadd.f32 %v1115_v15, %v2384_v44  ;;  %1249 = vadd.xlane.f32.xlu0 %v1248_v43 }
 0x30f   : > { %v1168_v49 = vmax.f32 %v1114_v14, 0.0 }
 0x310   : > { %v1169_v6 = vmax.f32 %v1116_v17, 0.0  ;;  %v1119_v20 = vpop.f32.mrb[54].mxu0  ;;  %v1251_v7 = vadd.f32 %v1211_v48, %v1210_v9 }
 0x311   : > { %v1212_v23 = vmul.f32 %v2391_v11, %v1168_v49  ;;  %v1120_v55 = vadd.f32 %v1119_v20, %v2381_v46  ;;  %v1121_v26 = vpop.f32.mrb[55].mxu0 }
 0x312   : > { %v1213_v28 = vmul.f32 %v2395_v51, %v1169_v6  ;;  %1252 = vadd.xlane.f32.xlu0 %v1251_v7  ;;  %v1122_v12 = vadd.f32 %v1121_v26, %v2384_v44  ;;  %v2460_v6 = vand.u32 127, %v390_v16 }
 0x313   : > { %v1170_v60 = vmax.f32 %v1120_v55, 0.0  ;;  %1275 = vperm.xlu1 %1778, %v1272_v54  }
 0x314   : > { %v1171_v29 = vmax.f32 %v1122_v12, 0.0  ;;  %v1125_v61 = vpop.f32.mrb[56].mxu0  ;;  %v1254_v13 = vadd.f32 %v1213_v28, %v1212_v23  ;;  %v1327_v54 = vadd.s32 4294967280, %v2460_v6  ;;  %v1318_v28 = vsub.s32 %v2460_v6, %v2247_v27 }
 0x315   : > { %v1214_v34 = vmul.f32 %v2391_v11, %v1170_v60  ;;  %v1126_v35 = vadd.f32 %v1125_v61, %v2381_v46  ;;  %v1127_v3 = vpop.f32.mrb[57].mxu0  ;;  %v1334_v61 = vadd.s32 4294967272, %v2460_v6 }
 0x316   : > { %v1215_v39 = vmul.f32 %v2395_v51, %v1171_v29  ;;  %v1128_v1 = vadd.f32 %v1127_v3, %v2384_v44  ;;  %1255 = vadd.xlane.f32.xlu0 %v1254_v13  ;;  %v1330_v60 = vsub.s32 %v1327_v54, %v2247_v27 }
 0x317   : > { %v1172_v18 = vmax.f32 %v1126_v35, 0.0  ;;  %v1341_v35 = vadd.s32 4294967264, %v2460_v6 }
 0x318   : > { %v1173_v41 = vmax.f32 %v1128_v1, 0.0  ;;  %v1131_v19 = vpop.f32.mrb[58].mxu0  ;;  %v1257_v10 = vadd.f32 %v1215_v39, %v1214_v34  ;;  %v1337_v1 = vsub.s32 %v1334_v61, %v2247_v27 }
 0x319   : > { %v1216_v47 = vmul.f32 %v2391_v11, %v1172_v18  ;;  %v1132_v50 = vadd.f32 %v1131_v19, %v2381_v46  ;;  %v1133_v24 = vpop.f32.mrb[59].mxu0 }
 0x31a   : > { %v1217_v21 = vmul.f32 %v2395_v51, %v1173_v41  ;;  %v1134_v52 = vadd.f32 %v1133_v24, %v2384_v44  ;;  %v1348_v41 = vadd.s32 4294967256, %v2460_v6  ;;  %v1355_v24 = vadd.s32 4294967248, %v2460_v6 }
 0x31b   : > { %v1174_v22 = vmax.f32 %v1132_v50, 0.0 }
 0x31c   : > { %v1175_v25 = vmax.f32 %v1134_v52, 0.0  ;;  %v1137_v53 = vpop.f32.mrb[60].mxu0  ;;  %v1260_v56 = vadd.f32 %v1217_v21, %v1216_v47  ;;  %v1344_v47 = vsub.s32 %v1341_v35, %v2247_v27 }
 0x31d   : > { %v1218_v57 = vmul.f32 %v2391_v11, %v1174_v22  ;;  %v1138_v32 = vadd.f32 %v1137_v53, %v2381_v46  ;;  %v1139_v30 = vpop.f32.mrb[61].mxu0  ;;  %v1351_v22 = vsub.s32 %v1348_v41, %v2247_v27 }
 0x31e   : > { %v1219_v33 = vmul.f32 %v2395_v51, %v1175_v25  ;;  %v1140_v45 = vadd.f32 %v1139_v30, %v2384_v44  ;;  %1261 = vadd.xlane.f32.xlu0 %v1260_v56  ;;  %v1358_v56 = vsub.s32 %v1355_v24, %v2247_v27 }
 0x31f   : > { %v1176_v58 = vmax.f32 %v1138_v32, 0.0 }
 0x320   : > { %v1177_v40 = vmax.f32 %v1140_v45, 0.0  ;;  %v1143_v31 = vpop.f32.mrb[32].mxu1  ;;  %v1263_v59 = vadd.f32 %v1219_v33, %v1218_v57  ;;  %v1362_v57 = vadd.s32 4294967240, %v2460_v6  ;;  %v1369_v33 = vadd.s32 4294967232, %v2460_v6 }
 0x321   : > { %v1220_v62 = vmul.f32 %v2391_v11, %v1176_v58  ;;  %v1144_v63 = vadd.f32 %v1143_v31, %v2381_v46  ;;  %v1145_v36 = vpop.f32.mrb[33].mxu1  ;;  %v1376_v58 = vadd.s32 4294967224, %v2460_v6 }
 0x322   : > { %v1221_v0 = vmul.f32 %v2395_v51, %v1177_v40  ;;  %v1146_v37 = vadd.f32 %v1145_v36, %v2384_v44  ;;  %1264 = vadd.xlane.f32.xlu0 %v1263_v59  ;;  %v1383_v40 = vadd.s32 4294967216, %v2460_v6  ;;  %v1365_v59 = vsub.s32 %v1362_v57, %v2247_v27 }
 0x323   : > { %v1178_v2 = vmax.f32 %v1144_v63, 0.0  ;;  %v1372_v36 = vsub.s32 %v1369_v33, %v2247_v27 }
 0x324   : > { %v1179_v4 = vmax.f32 %v1146_v37, 0.0  ;;  %v1266_v5 = vadd.f32 %v1221_v0, %v1220_v62 }
 0x325   : > { %v1222_v42 = vmul.f32 %v2391_v11, %v1178_v2  ;;  %v1379_v2 = vsub.s32 %v1376_v58, %v2247_v27 }
 0x326   : > { %v1223_v8 = vmul.f32 %v2395_v51, %v1179_v4  ;;  %1267 = vadd.xlane.f32.xlu0 %v1266_v5  ;;  %v1320_v51 = vadd.s32 4294967288, %v2460_v6  ;;  %v1390_v5 = vadd.s32 4294967208, %v2460_v6 }
 0x328   : > { %v1269_v43 = vadd.f32 %v1223_v8, %v1222_v42  ;;  %v1323_v16 = vsub.s32 %v1320_v51, %v2247_v27  ;;  %v1386_v8 = vsub.s32 %v1383_v40, %v2247_v27 }
 0x32a   : > { %1270 = vadd.xlane.f32.xlu0 %v1269_v43 }
 0x337   : > { %1258 = vadd.xlane.f32.xlu1 %v1257_v10 }
 0x37b   : > { %v1226_v9 = vpop.xlane.xlu0 %1225 }
 0x37f   : > { %v1229_v14 = vpop.xlane.xlu0 %1228 }
 0x383   : > { %v1232_v46 = vpop.xlane.xlu1 %1231 }
 0x387   : > { %v1235_v17 = vpop.xlane.xlu1 %1234 }
 0x38b   : > { %v1238_v15 = vpop.xlane.xlu0 %1237 }
 0x38f   : > { %v1241_v49 = vpop.xlane.xlu1 %1240 }
 0x393   : > { %v1244_v48 = vpop.xlane.xlu0 %1243  ;;  %v1276_v20 = vpop.permute.xlu1 %1275 }
 0x394   : > { %v2463_v11 = vrot.slane %v1276_v20, %v2256_v38  ;;  %v1393_v20 = vsub.s32 %v1390_v5, %v2247_v27 }
 0x396   : > { %v1282_v55 = vadd.f32 %v2463_v11, %v1226_v9  ;;  %v1283_v26 = vadd.f32 %v2463_v11, %v1229_v14  ;;  %v1284_v12 = vadd.f32 %v2463_v11, %v1232_v46  ;;  %v1285_v3 = vadd.f32 %v2463_v11, %v1235_v17 }
 0x397   : > { %v1247_v44 = vpop.xlane.xlu0 %1246  ;;  %v1286_v19 = vadd.f32 %v2463_v11, %v1238_v15  ;;  %v1287_v21 = vadd.f32 %v2463_v11, %v1241_v49  ;;  %v1288_v30 = vadd.f32 %v2463_v11, %v1244_v48  ;;  %v1397_v9 = vadd.s32 4294967200, %v2460_v6 }
 0x398   : > { %v1319_v38 = vrot.slane %v1282_v55, %v1318_v28  ;;  %v1324_v29 = vrot.slane %v1283_v26, %v1323_v16  ;;  %v1331_v34 = vrot.slane %v1284_v12, %v1330_v60  ;;  %v1338_v50 = vrot.slane %v1285_v3, %v1337_v1 }
 0x399   : > { %v1345_v25 = vrot.slane %v1286_v19, %v1344_v47  ;;  %v1352_v45 = vrot.slane %v1287_v21, %v1351_v22  ;;  %v1289_v62 = vadd.f32 %v2463_v11, %v1247_v44  ;;  %v1359_v63 = vrot.slane %v1288_v30, %v1358_v56 }
 0x39a   : > { %v1326_v39 = vsel %vm1325_vm1, %v1324_v29, %v1319_v38  ;;  %v1404_v46 = vadd.s32 4294967192, %v2460_v6  ;;  %v1411_v15 = vadd.s32 4294967184, %v2460_v6  ;;  %v1418_v17 = vadd.s32 4294967176, %v2460_v6 }
 0x39b   : > { %v1250_v7 = vpop.xlane.xlu0 %1249  ;;  %v1333_v10 = vsel %vm1332_vm2, %v1331_v34, %v1326_v39  ;;  %v1366_v14 = vrot.slane %v1289_v62, %v1365_v59  ;;  %v1400_v51 = vsub.s32 %v1397_v9, %v2247_v27 }
 0x39c   : > { %v1340_v52 = vsel %vm1339_vm3, %v1338_v50, %v1333_v10  ;;  %v1290_v0 = vadd.f32 %v2463_v11, %v1250_v7  ;;  %v1407_v26 = vsub.s32 %v1404_v46, %v2247_v27  ;;  %v1414_v6 = vsub.s32 %v1411_v15, %v2247_v27 }
 0x39d   : > { %v1347_v32 = vsel %vm1346_vm4, %v1345_v25, %v1340_v52  ;;  %v1421_v38 = vsub.s32 %v1418_v17, %v2247_v27 }
 0x39e   : > { %v1354_v31 = vsel %vm1353_vm5, %v1352_v45, %v1347_v32  ;;  %v1373_v48 = vrot.slane %v1290_v0, %v1372_v36 }
 0x39f   : > { %v1253_v23 = vpop.xlane.xlu0 %1252  ;;  %v1361_v42 = vsel %vm1360_vm6, %v1359_v63, %v1354_v31 }
 0x3a0   : > { %v1291_v4 = vadd.f32 %v2463_v11, %v1253_v23  ;;  %v1368_v49 = vsel %vm1367_vm7, %v1366_v14, %v1361_v42 }
 0x3a1   : > { %v1375_v12 = vsel %vm1374_vm8, %v1373_v48, %v1368_v49 }
 0x3a2   : > { %v1380_v44 = vrot.slane %v1291_v4, %v1379_v2 }
 0x3a3   : > { %v1256_v13 = vpop.xlane.xlu0 %1255 }
 0x3a4   : > { %v1292_v43 = vadd.f32 %v2463_v11, %v1256_v13  ;;  %v1382_v29 = vsel %vm1381_vm9, %v1380_v44, %v1375_v12 }
 0x3a6   : > { %v1387_v7 = vrot.slane %v1292_v43, %v1386_v8 }
 0x3a8   : > { %v1389_v34 = vsel %vm1388_vm10, %v1387_v7, %v1382_v29 }
 0x3ab   : > { %v1262_v18 = vpop.xlane.xlu0 %1261 }
 0x3ac   : > { %v1294_v54 = vadd.f32 %v2463_v11, %v1262_v18 }
 0x3ae   : > { %v1401_v35 = vrot.slane %v1294_v54, %v1400_v51 }
 0x3af   : > { %v1265_v53 = vpop.xlane.xlu0 %1264 }
 0x3b0   : > { %v1295_v28 = vadd.f32 %v2463_v11, %v1265_v53 }
 0x3b2   : > { %v1408_v3 = vrot.slane %v1295_v28, %v1407_v26 }
 0x3b3   : > { %v1268_v37 = vpop.xlane.xlu0 %1267 }
 0x3b4   : > { %v1296_v60 = vadd.f32 %v2463_v11, %v1268_v37 }
 0x3b6   : > { %v1415_v27 = vrot.slane %v1296_v60, %v1414_v6 }
 0x3b7   : > { %v1271_v23 = vpop.xlane.xlu0 %1270 }
 0x3b8   : > { %v1297_v61 = vadd.f32 %v2463_v11, %v1271_v23 }
 0x3ba   : > { %v1422_v18 = vrot.slane %v1297_v61, %v1421_v38 }
 0x3c4   : > { %v1259_v55 = vpop.xlane.xlu1 %1258 }
 0x3c5   : > { %v1293_v16 = vadd.f32 %v2463_v11, %v1259_v55 }
 0x3c7   : > { %v1394_v13 = vrot.slane %v1293_v16, %v1393_v20 }
 0x3c9   : > { %v1396_v39 = vsel %vm1395_vm11, %v1394_v13, %v1389_v34 }
 0x3ca   : > { %v1403_v1 = vsel %vm1402_vm12, %v1401_v35, %v1396_v39 }
 0x3cb   : > { %v1410_v11 = vsel %vm1409_vm13, %v1408_v3, %v1403_v1 }
 0x3cc   : > { %v1417_v41 = vsel %vm1416_vm14, %v1415_v27, %v1410_v11 }
 0x3cd   : > { %v1424_v19 = vsel %vm1423_vm15, %v1422_v18, %v1417_v41 }
 0x3ce   : > { %1426 = vst [vmem:[%s357_s27] sm:$0x1] %v1424_v19 }
 0x3cf   : > { %1849 = shalt.err (!%p1846_p11)
}
 0x3d0   : > { %s1850_s25 = scalar_lea.hbm %s2523_s30, 16  ;;  %s1854_s24 = scalar_lea.hbm %s2576_s9, 48 }
 0x3d1   : > { %p1851_p13 = scmp.ne.s32.totalorder %s2523_s30, %s1850_s25  ;;  %p1855_p6 = scmp.lt.u32.totalorder %s2523_s30, %s2576_s9 }
 0x3d2   : > { %p1856_p9 = scmp.lt.u32.totalorder %s1854_s24, %s1850_s25  ;;  %p1858_p10 = scmp.lt.u32.totalorder %s1850_s25, %s2523_s30 }
 0x3d3   : > { %p1852_p5 = pnand %p1851_p13, %p2592_p1 }
 0x3d4   : > { %p1857_p12 = por %p1856_p9, %p1855_p6 }
 0x3d5   : > { %p1853_p0 = pneg %p1852_p5 }
 0x3d6   : > { %p1859_p2 = por %p1858_p10, %p1857_p12 }
 0x3d8   : > { %p1860_p3 = pnand %p1859_p2, %p1853_p0 }
 0x3da   : > { %1863 = shalt.err (!%p1860_p3)
}
 0x3db   : > { %1722 = dma.vmem_to_hbm [thread:$0]  (%p2592_p1), %s2525_s26, 16, %s2523_s30, %s1428_s10  }
 0x3dc PF: > { %p1739_p4 = scmp.ge.s32.totalorder %s1906_s14, 2  ;;  %s1452_s27 = sand.u32 1, %s1894_s11  }
 0x3dd   : > { %p2593_p7 = scmp.ne.s32.totalorder %s2584_s21, 0  ;;  %s1453_s28 = scalar_lea.sflag [#allocation5], %s1452_s27 }
 0x3df   : > { %p1732_p8 = pnand %p1739_p4, %p2593_p7 }
 0x3e1   : > { %1889 = dma.done.wait (!%p1732_p8), %s1453_s28, 16  }
 0x3e2   : > { %1891 = vsyncadd (!%p1732_p8), %s1453_s28, 4294967280  ;;  %s2594_s29 = sld [smem:[#allocation12_spill]]  ;;  %s2595_s13 = sld [smem:[#allocation13_spill]] }
 0x3e3   : > { %p23_p11 = scmp.ge.s32.totalorder %s1993_s16, 5   ;;  %s2596_s11 = smov %s1898_s12 }
 0x3e4   : > { %s2598_s14 = smov %s1993_s16 }
 0x3e5   :  { %25 = sbr.rel (!%p23_p11) target bundleno = 8 (0x8), region = 100 }
 0x3e8   : > { %s2597_s12 = smov %s2594_s29 }
 0x3ec   :  { %1457 = vsyncpa [#allocation4], 1 }
 0x3ed   :  { %1459 = vsyncpa [#allocation4 + $0x1], 1 }
 0x3ee   :  { %1460 = vsyncpa [#allocation7], 1 }
 0x3ef   :  { %1461 = vsyncpa [#allocation5], 1 }
 0x3f0   :  { %1463 = vsyncpa [#allocation5 + $0x1], 1 }

</bundles_post_ra>
